<compile_context>
chip_gen: v6e
topology: v6e:2x2x1
jax: 0.10.0
libtpu: 0.0.40
codegen_flags: <defaults>
</compile_context>

<pallas_src>
import functools

import jax
import jax.numpy as jnp
from jax import lax
from jax.experimental import pallas as pl
from jax.experimental.pallas import tpu as pltpu

HIDDEN = 128


def _actor_kernel(act_limit, T, din_p,
                  hist_ref,        # (Bt, T*din_p) bf16, lane-dense, batch-major
                  seg_ref,         # (Bt, 1) i32   clamped gather index
                  obs_ref,         # (Bt, obs_dim_p) bf16
                  w_hist, b_hist,            # (din_p,128) bf16, (1,128) f32
                  w_ih, w_hh, b_rnn,         # (128,128) bf16 x2, (1,128) f32
                  w_c1, b_c1,                # (obs_dim_p,128) bf16, (1,128) f32
                  w_c2, b_c2,                # (128,128) bf16, (1,128) f32
                  w_m1a, w_m1b, b_m1,        # (128,128) bf16 x2, (1,128) f32
                  w_m2, b_m2,                # (128,act_dim) bf16, (1,act_dim) f32
                  o_ref,                     # (Bt, act_dim) f32
                  xwih_scr):                 # (T, Bt, 128) f32 scratch
    Bt = obs_ref.shape[0]

    # ---- Hoisted non-recurrent precompute, chunked per time step ----------
    #   pre_t  = relu(x_t @ W_hist + b_hist)      (Bt,128) bounded temporary
    #   xwih_t = pre_t @ W_ih + (b_ih + b_hh)     -> xwih_scr[t]  (time-major)
    w_hist_v = w_hist[...]
    w_ih_v = w_ih[...]
    b_hist_v = b_hist[...]
    b_rnn_v = b_rnn[...]
    for t in range(T):                         # static T; static column windows
        x_t = hist_ref[:, t * din_p:(t + 1) * din_p]           # (Bt, din_p)
        pre = jnp.maximum(
            jnp.dot(x_t, w_hist_v, preferred_element_type=jnp.float32)
            + b_hist_v, 0.0)
        xwih_scr[t] = (
            jnp.dot(pre.astype(jnp.bfloat16), w_ih_v,
                    preferred_element_type=jnp.float32) + b_rnn_v)

    # ---- Serial recurrence: only bf16 h @ W_hh + tanh stays on the chain ---
    seg = seg_ref[...]                          # (Bt, 1) int32
    w_hh_v = w_hh[...]                          # bf16, hoisted once
    h0 = jnp.zeros((Bt, HIDDEN), jnp.bfloat16)
    hout0 = jnp.zeros((Bt, HIDDEN), jnp.float32)

    def step(t, carry):
        h, hout = carry
        x_t = xwih_scr[t]                       # contiguous read, off the chain
        h_new = jnp.tanh(
            x_t + jnp.dot(h, w_hh_v, preferred_element_type=jnp.float32))
        hout = jnp.where(seg == t, h_new, hout)   # torch.gather over time
        return h_new.astype(jnp.bfloat16), hout

    _, hist_out = lax.fori_loop(0, T, step, (h0, hout0),
                                unroll=True if T <= 32 else 8)

    # ---- Current-observation branch + combined head ------------------------
    c = jnp.maximum(
        jnp.dot(obs_ref[...], w_c1[...], preferred_element_type=jnp.float32)
        + b_c1[...], 0.0)
    c = jnp.maximum(
        jnp.dot(c.astype(jnp.bfloat16), w_c2[...],
                preferred_element_type=jnp.float32) + b_c2[...], 0.0)
    # combined_linear1 on cat([hist_out, c]) == hist_out @ W[:128] + c @ W[128:]
    comb = jnp.maximum(
        jnp.dot(hist_out.astype(jnp.bfloat16), w_m1a[...],
                preferred_element_type=jnp.float32)
        + jnp.dot(c.astype(jnp.bfloat16), w_m1b[...],
                  preferred_element_type=jnp.float32)
        + b_m1[...], 0.0)
    act = jnp.tanh(
        jnp.dot(comb.astype(jnp.bfloat16), w_m2[...],
                preferred_element_type=jnp.float32) + b_m2[...])
    o_ref[...] = act_limit * act


def _round_up(x, m):
    return (x + m - 1) // m * m


def _cdiv(a, b):
    return (a + b - 1) // b


def _choose_tiling(B, T, din_p):
    """Pick (b_tile, b_pad, num_tiles, vmem_limit_bytes).

    b_tile is chosen first (capped at 256 and by a VMEM budget), then the batch
    is padded up to num_tiles * b_tile with rows balanced across tiles, so
    awkward batch sizes never fall back to tiny 8-row tiles.  Whenever there is
    enough batch, num_tiles >= 2 so both v7x TensorCores get a parallel tile
    (no cost on single-core v5e/v6e, where the grid just iterates).
    """
    b8 = _round_up(max(B, 1), 8)
    hist_lanes = _round_up(T * din_p, 128)          # VMEM lanes per history row
    per_row = (2 * 2 * hist_lanes                   # bf16 hist block, 2 buffers
               + 4 * T * HIDDEN                     # f32 xwih scratch
               + 8 * HIDDEN                         # bounded pre/carry temps
               + 1024)                              # seg/obs/out blocks, slack
    budget = 24 << 20                               # fits every TPU generation
    row_cap = max(8, (budget // per_row) // 8 * 8)
    cap = min(256, row_cap)                         # keep M large, bound spills
    if b8 >= 16:
        cap = min(cap, _round_up(_cdiv(b8, 2), 8))  # >=2 tiles (v7x: 2 TCs)
    cap = max(cap, 8)
    num_tiles = _cdiv(b8, cap)
    b_tile = _round_up(_cdiv(b8, num_tiles), 8)     # balance rows across tiles
    b_pad = b_tile * num_tiles
    est = per_row * b_tile + (3 << 20)              # + resident weights, slack
    vmem_limit = int(min(max(est, 32 << 20), 48 << 20))
    return b_tile, b_pad, num_tiles, vmem_limit


def rnn_td3_actor_forward(params, obs, hist_obs, hist_act, hist_seg_len,
                          act_limit):
    """Pallas wrapper: padding, batch tiling, lane-dense layout, pallas_call."""
    B, T, obs_dim = hist_obs.shape
    act_dim = params["w_m2"].shape[1]
    din = obs_dim + hist_act.shape[-1]
    din_p = _round_up(din, 8)
    obs_dim_p = _round_up(obs_dim, 8)

    b_tile, b_pad, num_tiles, vmem_limit = _choose_tiling(B, T, din_p)

    # History: concat(obs, act) -> pad features to din_p and batch to b_pad,
    # then a plain reshape to the lane-dense (b_pad, T*din_p) slab.
    # No transpose, no extra HBM relayout pass.
    hist_x = jnp.concatenate([hist_obs, hist_act], axis=-1).astype(jnp.float32)
    hist_x = jnp.pad(hist_x, ((0, b_pad - B), (0, 0), (0, din_p - din)))
    hist2d = hist_x.reshape(b_pad, T * din_p).astype(jnp.bfloat16)

    obs_p = jnp.pad(obs.astype(jnp.float32),
                    ((0, b_pad - B), (0, obs_dim_p - obs_dim)))
    obs_p = obs_p.astype(jnp.bfloat16)

    # gather index = max(hist_seg_len, 1) - 1, clamped to T-1.
    seg_idx = jnp.clip(hist_seg_len.astype(jnp.int32) - 1, 0, T - 1)
    seg_idx = jnp.pad(seg_idx.reshape(B, 1), ((0, b_pad - B), (0, 0)))

    bf = lambda x: jnp.asarray(x, jnp.bfloat16)
    f32 = lambda x: jnp.asarray(x, jnp.float32)
    w_hist = bf(jnp.pad(f32(params["w_hist"]), ((0, din_p - din), (0, 0))))
    w_c1 = bf(jnp.pad(f32(params["w_c1"]), ((0, obs_dim_p - obs_dim), (0, 0))))
    w_m1a = bf(params["w_m1"][:HIDDEN])
    w_m1b = bf(params["w_m1"][HIDDEN:])

    weights = (w_hist, f32(params["b_hist"]),
               bf(params["w_ih"]), bf(params["w_hh"]), f32(params["b_rnn"]),
               w_c1, f32(params["b_c1"]),
               bf(params["w_c2"]), f32(params["b_c2"]),
               w_m1a, w_m1b, f32(params["b_m1"]),
               bf(params["w_m2"]), f32(params["b_m2"]))

    def resident(w):        # constant index_map -> stays in VMEM across steps
        return pl.BlockSpec(w.shape, lambda i: (0, 0))

    in_specs = [
        pl.BlockSpec((b_tile, T * din_p), lambda i: (i, 0)),   # history slab
        pl.BlockSpec((b_tile, 1), lambda i: (i, 0)),           # gather index
        pl.BlockSpec((b_tile, obs_dim_p), lambda i: (i, 0)),   # current obs
    ] + [resident(w) for w in weights]

    out = pl.pallas_call(
        functools.partial(_actor_kernel, float(act_limit), T, din_p),
        out_shape=jax.ShapeDtypeStruct((b_pad, act_dim), jnp.float32),
        grid=(num_tiles,),
        in_specs=in_specs,
        out_specs=pl.BlockSpec((b_tile, act_dim), lambda i: (i, 0)),
        scratch_shapes=[pltpu.VMEM((T, b_tile, HIDDEN), jnp.float32)],
        compiler_params=pltpu.CompilerParams(
            dimension_semantics=("parallel",),
            vmem_limit_bytes=vmem_limit),
    )(hist2d, seg_idx, obs_p, *weights)

    return out[:B]


def reference_forward(params, obs, hist_obs, hist_act, hist_seg_len, act_limit):
    """Plain-JAX f32 reference matching the PyTorch train=True forward."""
    B = obs.shape[0]
    x = jnp.concatenate([hist_obs, hist_act], axis=-1)
    x = jax.nn.relu(x @ params["w_hist"] + params["b_hist"])          # (B,T,128)

    def cell(h, xt):
        h = jnp.tanh(xt @ params["w_ih"] + h @ params["w_hh"] + params["b_rnn"])
        return h, h

    h0 = jnp.zeros((B, HIDDEN), jnp.float32)
    _, hs = lax.scan(cell, h0, jnp.swapaxes(x, 0, 1))                  # (T,B,128)
    hs = jnp.swapaxes(hs, 0, 1)                                        # (B,T,128)
    seg = jnp.maximum(hist_seg_len, 1) - 1
    hist_out = hs[jnp.arange(B), seg]                                  # (B,128)

    c = jax.nn.relu(obs @ params["w_c1"] + params["b_c1"])
    c = jax.nn.relu(c @ params["w_c2"] + params["b_c2"])
    comb = jnp.concatenate([hist_out, c], axis=-1)
    comb = jax.nn.relu(comb @ params["w_m1"] + params["b_m1"])
    return act_limit * jnp.tanh(comb @ params["w_m2"] + params["b_m2"])


def init_params(key, obs_dim, act_dim):
    """Deterministic synthetic parameters (layout: (in_features, out_features))."""
    ks = jax.random.split(key, 16)

    def lin(kw, kb, fan_in, fan_out):
        bound = 1.0 / jnp.sqrt(fan_in)
        w = jax.random.uniform(kw, (fan_in, fan_out), jnp.float32, -bound, bound)
        b = jax.random.uniform(kb, (1, fan_out), jnp.float32, -bound, bound)
        return w, b

    p = {}
    p["w_hist"], p["b_hist"] = lin(ks[0], ks[1], obs_dim + act_dim, HIDDEN)
    p["w_ih"], b_ih = lin(ks[2], ks[3], HIDDEN, HIDDEN)
    p["w_hh"], b_hh = lin(ks[4], ks[5], HIDDEN, HIDDEN)
    p["b_rnn"] = b_ih + b_hh   # exact: tanh(xW + b_ih + hW + b_hh)
    p["w_c1"], p["b_c1"] = lin(ks[6], ks[7], obs_dim, HIDDEN)
    p["w_c2"], p["b_c2"] = lin(ks[8], ks[9], HIDDEN, HIDDEN)
    p["w_m1"], p["b_m1"] = lin(ks[10], ks[11], 2 * HIDDEN, HIDDEN)
    p["w_m2"], p["b_m2"] = lin(ks[12], ks[13], HIDDEN, act_dim)
    return p


if __name__ == "__main__":
    obs_dim, act_dim = 11, 3
    T = 8
    act_limit = 2.0

    key = jax.random.PRNGKey(0)
    k_p, k_a, k_b = jax.random.split(key, 3)
    params = init_params(k_p, obs_dim, act_dim)

    def run_case(B, case_key, hist_seg_len):
        ko, kh, ka = jax.random.split(case_key, 3)
        obs = jax.random.normal(ko, (B, obs_dim), jnp.float32)
        hist_obs = jax.random.normal(kh, (B, T, obs_dim), jnp.float32)
        hist_act = jax.random.normal(ka, (B, T, act_dim), jnp.float32)
        out = jax.block_until_ready(
            rnn_td3_actor_forward(params, obs, hist_obs, hist_act,
                                  hist_seg_len, act_limit))
        ref = reference_forward(params, obs, hist_obs, hist_act,
                                hist_seg_len, act_limit)
        assert out.shape == (B, act_dim)
        err = jnp.max(jnp.abs(out - ref))
        assert jnp.allclose(out, ref, atol=5e-2, rtol=5e-2), (B, err)

    # Single-tile case; exercises the hist_seg_len == 0 -> 1 clamp.
    run_case(2, k_a, jnp.array([0, 5], jnp.int32))
    # Multi-tile case (>=2 parallel grid tiles, padded batch rows sliced away).
    run_case(24, k_b, (jnp.arange(24, dtype=jnp.int32) % (T + 1)))

    print("KERNEL_OK")
</pallas_src>

<mosaic_0001>
module attributes {stable_mosaic.version = 11 : i64} {
  func.func @_actor_kernel(%arg0: i32, %arg1: memref<8x128xbf16, #tpu.memory_space<vmem>>, %arg2: memref<8x1xi32, #tpu.memory_space<vmem>>, %arg3: memref<8x16xbf16, #tpu.memory_space<vmem>>, %arg4: memref<16x128xbf16, #tpu.memory_space<vmem>>, %arg5: memref<1x128xf32, #tpu.memory_space<vmem>>, %arg6: memref<128x128xbf16, #tpu.memory_space<vmem>>, %arg7: memref<128x128xbf16, #tpu.memory_space<vmem>>, %arg8: memref<1x128xf32, #tpu.memory_space<vmem>>, %arg9: memref<16x128xbf16, #tpu.memory_space<vmem>>, %arg10: memref<1x128xf32, #tpu.memory_space<vmem>>, %arg11: memref<128x128xbf16, #tpu.memory_space<vmem>>, %arg12: memref<1x128xf32, #tpu.memory_space<vmem>>, %arg13: memref<128x128xbf16, #tpu.memory_space<vmem>>, %arg14: memref<128x128xbf16, #tpu.memory_space<vmem>>, %arg15: memref<1x128xf32, #tpu.memory_space<vmem>>, %arg16: memref<128x3xbf16, #tpu.memory_space<vmem>>, %arg17: memref<1x3xf32, #tpu.memory_space<vmem>>, %arg18: memref<8x3xf32, #tpu.memory_space<vmem>>, %arg19: memref<8x8x128xf32, #tpu.memory_space<vmem>>) attributes {dimension_semantics = [#tpu.dimension_semantics<parallel>], iteration_bounds = array<i64: 1>, scalar_prefetch = 0 : i64, scratch_operands = 1 : i64, tpu.core_type = #tpu.core_type<tc>, window_params = [{transform_indices = @transform_0, window_bounds = array<i64: 8, 128>}, {transform_indices = @transform_1, window_bounds = array<i64: 8, 1>}, {transform_indices = @transform_2, window_bounds = array<i64: 8, 16>}, {pipeline_mode = #tpu.pipeline_mode<synchronous>, transform_indices = @transform_3, window_bounds = array<i64: 16, 128>}, {pipeline_mode = #tpu.pipeline_mode<synchronous>, transform_indices = @transform_4, window_bounds = array<i64: 1, 128>}, {pipeline_mode = #tpu.pipeline_mode<synchronous>, transform_indices = @transform_5, window_bounds = array<i64: 128, 128>}, {pipeline_mode = #tpu.pipeline_mode<synchronous>, transform_indices = @transform_6, window_bounds = array<i64: 128, 128>}, {pipeline_mode = #tpu.pipeline_mode<synchronous>, transform_indices = @transform_7, window_bounds = array<i64: 1, 128>}, {pipeline_mode = #tpu.pipeline_mode<synchronous>, transform_indices = @transform_8, window_bounds = array<i64: 16, 128>}, {pipeline_mode = #tpu.pipeline_mode<synchronous>, transform_indices = @transform_9, window_bounds = array<i64: 1, 128>}, {pipeline_mode = #tpu.pipeline_mode<synchronous>, transform_indices = @transform_10, window_bounds = array<i64: 128, 128>}, {pipeline_mode = #tpu.pipeline_mode<synchronous>, transform_indices = @transform_11, window_bounds = array<i64: 1, 128>}, {pipeline_mode = #tpu.pipeline_mode<synchronous>, transform_indices = @transform_12, window_bounds = array<i64: 128, 128>}, {pipeline_mode = #tpu.pipeline_mode<synchronous>, transform_indices = @transform_13, window_bounds = array<i64: 128, 128>}, {pipeline_mode = #tpu.pipeline_mode<synchronous>, transform_indices = @transform_14, window_bounds = array<i64: 1, 128>}, {pipeline_mode = #tpu.pipeline_mode<synchronous>, transform_indices = @transform_15, window_bounds = array<i64: 128, 3>}, {pipeline_mode = #tpu.pipeline_mode<synchronous>, transform_indices = @transform_16, window_bounds = array<i64: 1, 3>}, {transform_indices = @transform_17, window_bounds = array<i64: 8, 3>}]} {
    %c0 = arith.constant 0 : index
    %c0_0 = arith.constant 0 : index
    %0 = vector.load %arg4[%c0, %c0_0] : memref<16x128xbf16, #tpu.memory_space<vmem>>, vector<16x128xbf16>
    %c0_1 = arith.constant 0 : index
    %c0_2 = arith.constant 0 : index
    %1 = vector.load %arg6[%c0_1, %c0_2] : memref<128x128xbf16, #tpu.memory_space<vmem>>, vector<128x128xbf16>
    %c0_3 = arith.constant 0 : index
    %c0_4 = arith.constant 0 : index
    %2 = vector.load %arg5[%c0_3, %c0_4] : memref<1x128xf32, #tpu.memory_space<vmem>>, vector<1x128xf32>
    %c0_5 = arith.constant 0 : index
    %c0_6 = arith.constant 0 : index
    %3 = vector.load %arg8[%c0_5, %c0_6] : memref<1x128xf32, #tpu.memory_space<vmem>>, vector<1x128xf32>
    %c0_7 = arith.constant 0 : index
    %c0_8 = arith.constant 0 : index
    %4 = vector.load %arg1[%c0_7, %c0_8] : memref<8x128xbf16, #tpu.memory_space<vmem>>, vector<8x16xbf16>
    %cst = arith.constant dense<0.000000e+00> : vector<8x128xf32>
    %5 = tpu.matmul %4, %0, %cst {dimension_numbers = #tpu.dot_dimension_numbers<[1], [0], [0], [1], [0, 0, 1, 1], [], []>} : vector<8x16xbf16>, vector<16x128xbf16>, vector<8x128xf32> -> vector<8x128xf32>
    %6 = vector.broadcast %2 : vector<1x128xf32> to vector<8x128xf32>
    %7 = arith.addf %5, %6 : vector<8x128xf32>
    %cst_9 = arith.constant 0.000000e+00 : f32
    %8 = vector.broadcast %cst_9 : f32 to vector<8x128xf32>
    %9 = arith.maximumf %7, %8 : vector<8x128xf32>
    %10 = arith.truncf %9 : vector<8x128xf32> to vector<8x128xbf16>
    %cst_10 = arith.constant dense<0.000000e+00> : vector<8x128xf32>
    %11 = tpu.matmul %10, %1, %cst_10 {dimension_numbers = #tpu.dot_dimension_numbers<[1], [0], [0], [1], [0, 0, 1, 1], [], []>} : vector<8x128xbf16>, vector<128x128xbf16>, vector<8x128xf32> -> vector<8x128xf32>
    %12 = vector.broadcast %3 : vector<1x128xf32> to vector<8x128xf32>
    %13 = arith.addf %11, %12 : vector<8x128xf32>
    %c0_11 = arith.constant 0 : index
    %c0_12 = arith.constant 0 : index
    %c0_13 = arith.constant 0 : index
    %14 = vector.load %arg19[%c0_11, %c0_12, %c0_13] : memref<8x8x128xf32, #tpu.memory_space<vmem>>, vector<1x8x128xf32>
    %15 = vector.shape_cast %14 : vector<1x8x128xf32> to vector<8x128xf32>
    %16 = vector.shape_cast %13 : vector<8x128xf32> to vector<1x8x128xf32>
    tpu.vector_store %arg19[%c0_11, %c0_12, %c0_13], %16 {strides = array<i32>} : memref<8x8x128xf32, #tpu.memory_space<vmem>>, vector<1x8x128xf32>,
    %c0_14 = arith.constant 0 : index
    %c16 = arith.constant 16 : index
    %17 = vector.load %arg1[%c0_14, %c16] : memref<8x128xbf16, #tpu.memory_space<vmem>>, vector<8x16xbf16>
    %cst_15 = arith.constant dense<0.000000e+00> : vector<8x128xf32>
    %18 = tpu.matmul %17, %0, %cst_15 {dimension_numbers = #tpu.dot_dimension_numbers<[1], [0], [0], [1], [0, 0, 1, 1], [], []>} : vector<8x16xbf16>, vector<16x128xbf16>, vector<8x128xf32> -> vector<8x128xf32>
    %19 = vector.broadcast %2 : vector<1x128xf32> to vector<8x128xf32>
    %20 = arith.addf %18, %19 : vector<8x128xf32>
    %cst_16 = arith.constant 0.000000e+00 : f32
    %21 = vector.broadcast %cst_16 : f32 to vector<8x128xf32>
    %22 = arith.maximumf %20, %21 : vector<8x128xf32>
    %23 = arith.truncf %22 : vector<8x128xf32> to vector<8x128xbf16>
    %cst_17 = arith.constant dense<0.000000e+00> : vector<8x128xf32>
    %24 = tpu.matmul %23, %1, %cst_17 {dimension_numbers = #tpu.dot_dimension_numbers<[1], [0], [0], [1], [0, 0, 1, 1], [], []>} : vector<8x128xbf16>, vector<128x128xbf16>, vector<8x128xf32> -> vector<8x128xf32>
    %25 = vector.broadcast %3 : vector<1x128xf32> to vector<8x128xf32>
    %26 = arith.addf %24, %25 : vector<8x128xf32>
    %c1 = arith.constant 1 : index
    %c0_18 = arith.constant 0 : index
    %c0_19 = arith.constant 0 : index
    %27 = vector.load %arg19[%c1, %c0_18, %c0_19] : memref<8x8x128xf32, #tpu.memory_space<vmem>>, vector<1x8x128xf32>
    %28 = vector.shape_cast %27 : vector<1x8x128xf32> to vector<8x128xf32>
    %29 = vector.shape_cast %26 : vector<8x128xf32> to vector<1x8x128xf32>
    tpu.vector_store %arg19[%c1, %c0_18, %c0_19], %29 {strides = array<i32>} : memref<8x8x128xf32, #tpu.memory_space<vmem>>, vector<1x8x128xf32>,
    %c0_20 = arith.constant 0 : index
    %c32 = arith.constant 32 : index
    %30 = vector.load %arg1[%c0_20, %c32] : memref<8x128xbf16, #tpu.memory_space<vmem>>, vector<8x16xbf16>
    %cst_21 = arith.constant dense<0.000000e+00> : vector<8x128xf32>
    %31 = tpu.matmul %30, %0, %cst_21 {dimension_numbers = #tpu.dot_dimension_numbers<[1], [0], [0], [1], [0, 0, 1, 1], [], []>} : vector<8x16xbf16>, vector<16x128xbf16>, vector<8x128xf32> -> vector<8x128xf32>
    %32 = vector.broadcast %2 : vector<1x128xf32> to vector<8x128xf32>
    %33 = arith.addf %31, %32 : vector<8x128xf32>
    %cst_22 = arith.constant 0.000000e+00 : f32
    %34 = vector.broadcast %cst_22 : f32 to vector<8x128xf32>
    %35 = arith.maximumf %33, %34 : vector<8x128xf32>
    %36 = arith.truncf %35 : vector<8x128xf32> to vector<8x128xbf16>
    %cst_23 = arith.constant dense<0.000000e+00> : vector<8x128xf32>
    %37 = tpu.matmul %36, %1, %cst_23 {dimension_numbers = #tpu.dot_dimension_numbers<[1], [0], [0], [1], [0, 0, 1, 1], [], []>} : vector<8x128xbf16>, vector<128x128xbf16>, vector<8x128xf32> -> vector<8x128xf32>
    %38 = vector.broadcast %3 : vector<1x128xf32> to vector<8x128xf32>
    %39 = arith.addf %37, %38 : vector<8x128xf32>
    %c2 = arith.constant 2 : index
    %c0_24 = arith.constant 0 : index
    %c0_25 = arith.constant 0 : index
    %40 = vector.load %arg19[%c2, %c0_24, %c0_25] : memref<8x8x128xf32, #tpu.memory_space<vmem>>, vector<1x8x128xf32>
    %41 = vector.shape_cast %40 : vector<1x8x128xf32> to vector<8x128xf32>
    %42 = vector.shape_cast %39 : vector<8x128xf32> to vector<1x8x128xf32>
    tpu.vector_store %arg19[%c2, %c0_24, %c0_25], %42 {strides = array<i32>} : memref<8x8x128xf32, #tpu.memory_space<vmem>>, vector<1x8x128xf32>,
    %c0_26 = arith.constant 0 : index
    %c48 = arith.constant 48 : index
    %43 = vector.load %arg1[%c0_26, %c48] : memref<8x128xbf16, #tpu.memory_space<vmem>>, vector<8x16xbf16>
    %cst_27 = arith.constant dense<0.000000e+00> : vector<8x128xf32>
    %44 = tpu.matmul %43, %0, %cst_27 {dimension_numbers = #tpu.dot_dimension_numbers<[1], [0], [0], [1], [0, 0, 1, 1], [], []>} : vector<8x16xbf16>, vector<16x128xbf16>, vector<8x128xf32> -> vector<8x128xf32>
    %45 = vector.broadcast %2 : vector<1x128xf32> to vector<8x128xf32>
    %46 = arith.addf %44, %45 : vector<8x128xf32>
    %cst_28 = arith.constant 0.000000e+00 : f32
    %47 = vector.broadcast %cst_28 : f32 to vector<8x128xf32>
    %48 = arith.maximumf %46, %47 : vector<8x128xf32>
    %49 = arith.truncf %48 : vector<8x128xf32> to vector<8x128xbf16>
    %cst_29 = arith.constant dense<0.000000e+00> : vector<8x128xf32>
    %50 = tpu.matmul %49, %1, %cst_29 {dimension_numbers = #tpu.dot_dimension_numbers<[1], [0], [0], [1], [0, 0, 1, 1], [], []>} : vector<8x128xbf16>, vector<128x128xbf16>, vector<8x128xf32> -> vector<8x128xf32>
    %51 = vector.broadcast %3 : vector<1x128xf32> to vector<8x128xf32>
    %52 = arith.addf %50, %51 : vector<8x128xf32>
    %c3 = arith.constant 3 : index
    %c0_30 = arith.constant 0 : index
    %c0_31 = arith.constant 0 : index
    %53 = vector.load %arg19[%c3, %c0_30, %c0_31] : memref<8x8x128xf32, #tpu.memory_space<vmem>>, vector<1x8x128xf32>
    %54 = vector.shape_cast %53 : vector<1x8x128xf32> to vector<8x128xf32>
    %55 = vector.shape_cast %52 : vector<8x128xf32> to vector<1x8x128xf32>
    tpu.vector_store %arg19[%c3, %c0_30, %c0_31], %55 {strides = array<i32>} : memref<8x8x128xf32, #tpu.memory_space<vmem>>, vector<1x8x128xf32>,
    %c0_32 = arith.constant 0 : index
    %c64 = arith.constant 64 : index
    %56 = vector.load %arg1[%c0_32, %c64] : memref<8x128xbf16, #tpu.memory_space<vmem>>, vector<8x16xbf16>
    %cst_33 = arith.constant dense<0.000000e+00> : vector<8x128xf32>
    %57 = tpu.matmul %56, %0, %cst_33 {dimension_numbers = #tpu.dot_dimension_numbers<[1], [0], [0], [1], [0, 0, 1, 1], [], []>} : vector<8x16xbf16>, vector<16x128xbf16>, vector<8x128xf32> -> vector<8x128xf32>
    %58 = vector.broadcast %2 : vector<1x128xf32> to vector<8x128xf32>
    %59 = arith.addf %57, %58 : vector<8x128xf32>
    %cst_34 = arith.constant 0.000000e+00 : f32
    %60 = vector.broadcast %cst_34 : f32 to vector<8x128xf32>
    %61 = arith.maximumf %59, %60 : vector<8x128xf32>
    %62 = arith.truncf %61 : vector<8x128xf32> to vector<8x128xbf16>
    %cst_35 = arith.constant dense<0.000000e+00> : vector<8x128xf32>
    %63 = tpu.matmul %62, %1, %cst_35 {dimension_numbers = #tpu.dot_dimension_numbers<[1], [0], [0], [1], [0, 0, 1, 1], [], []>} : vector<8x128xbf16>, vector<128x128xbf16>, vector<8x128xf32> -> vector<8x128xf32>
    %64 = vector.broadcast %3 : vector<1x128xf32> to vector<8x128xf32>
    %65 = arith.addf %63, %64 : vector<8x128xf32>
    %c4 = arith.constant 4 : index
    %c0_36 = arith.constant 0 : index
    %c0_37 = arith.constant 0 : index
    %66 = vector.load %arg19[%c4, %c0_36, %c0_37] : memref<8x8x128xf32, #tpu.memory_space<vmem>>, vector<1x8x128xf32>
    %67 = vector.shape_cast %66 : vector<1x8x128xf32> to vector<8x128xf32>
    %68 = vector.shape_cast %65 : vector<8x128xf32> to vector<1x8x128xf32>
    tpu.vector_store %arg19[%c4, %c0_36, %c0_37], %68 {strides = array<i32>} : memref<8x8x128xf32, #tpu.memory_space<vmem>>, vector<1x8x128xf32>,
    %c0_38 = arith.constant 0 : index
    %c80 = arith.constant 80 : index
    %69 = vector.load %arg1[%c0_38, %c80] : memref<8x128xbf16, #tpu.memory_space<vmem>>, vector<8x16xbf16>
    %cst_39 = arith.constant dense<0.000000e+00> : vector<8x128xf32>
    %70 = tpu.matmul %69, %0, %cst_39 {dimension_numbers = #tpu.dot_dimension_numbers<[1], [0], [0], [1], [0, 0, 1, 1], [], []>} : vector<8x16xbf16>, vector<16x128xbf16>, vector<8x128xf32> -> vector<8x128xf32>
    %71 = vector.broadcast %2 : vector<1x128xf32> to vector<8x128xf32>
    %72 = arith.addf %70, %71 : vector<8x128xf32>
    %cst_40 = arith.constant 0.000000e+00 : f32
    %73 = vector.broadcast %cst_40 : f32 to vector<8x128xf32>
    %74 = arith.maximumf %72, %73 : vector<8x128xf32>
    %75 = arith.truncf %74 : vector<8x128xf32> to vector<8x128xbf16>
    %cst_41 = arith.constant dense<0.000000e+00> : vector<8x128xf32>
    %76 = tpu.matmul %75, %1, %cst_41 {dimension_numbers = #tpu.dot_dimension_numbers<[1], [0], [0], [1], [0, 0, 1, 1], [], []>} : vector<8x128xbf16>, vector<128x128xbf16>, vector<8x128xf32> -> vector<8x128xf32>
    %77 = vector.broadcast %3 : vector<1x128xf32> to vector<8x128xf32>
    %78 = arith.addf %76, %77 : vector<8x128xf32>
    %c5 = arith.constant 5 : index
    %c0_42 = arith.constant 0 : index
    %c0_43 = arith.constant 0 : index
    %79 = vector.load %arg19[%c5, %c0_42, %c0_43] : memref<8x8x128xf32, #tpu.memory_space<vmem>>, vector<1x8x128xf32>
    %80 = vector.shape_cast %79 : vector<1x8x128xf32> to vector<8x128xf32>
    %81 = vector.shape_cast %78 : vector<8x128xf32> to vector<1x8x128xf32>
    tpu.vector_store %arg19[%c5, %c0_42, %c0_43], %81 {strides = array<i32>} : memref<8x8x128xf32, #tpu.memory_space<vmem>>, vector<1x8x128xf32>,
    %c0_44 = arith.constant 0 : index
    %c96 = arith.constant 96 : index
    %82 = vector.load %arg1[%c0_44, %c96] : memref<8x128xbf16, #tpu.memory_space<vmem>>, vector<8x16xbf16>
    %cst_45 = arith.constant dense<0.000000e+00> : vector<8x128xf32>
    %83 = tpu.matmul %82, %0, %cst_45 {dimension_numbers = #tpu.dot_dimension_numbers<[1], [0], [0], [1], [0, 0, 1, 1], [], []>} : vector<8x16xbf16>, vector<16x128xbf16>, vector<8x128xf32> -> vector<8x128xf32>
    %84 = vector.broadcast %2 : vector<1x128xf32> to vector<8x128xf32>
    %85 = arith.addf %83, %84 : vector<8x128xf32>
    %cst_46 = arith.constant 0.000000e+00 : f32
    %86 = vector.broadcast %cst_46 : f32 to vector<8x128xf32>
    %87 = arith.maximumf %85, %86 : vector<8x128xf32>
    %88 = arith.truncf %87 : vector<8x128xf32> to vector<8x128xbf16>
    %cst_47 = arith.constant dense<0.000000e+00> : vector<8x128xf32>
    %89 = tpu.matmul %88, %1, %cst_47 {dimension_numbers = #tpu.dot_dimension_numbers<[1], [0], [0], [1], [0, 0, 1, 1], [], []>} : vector<8x128xbf16>, vector<128x128xbf16>, vector<8x128xf32> -> vector<8x128xf32>
    %90 = vector.broadcast %3 : vector<1x128xf32> to vector<8x128xf32>
    %91 = arith.addf %89, %90 : vector<8x128xf32>
    %c6 = arith.constant 6 : index
    %c0_48 = arith.constant 0 : index
    %c0_49 = arith.constant 0 : index
    %92 = vector.load %arg19[%c6, %c0_48, %c0_49] : memref<8x8x128xf32, #tpu.memory_space<vmem>>, vector<1x8x128xf32>
    %93 = vector.shape_cast %92 : vector<1x8x128xf32> to vector<8x128xf32>
    %94 = vector.shape_cast %91 : vector<8x128xf32> to vector<1x8x128xf32>
    tpu.vector_store %arg19[%c6, %c0_48, %c0_49], %94 {strides = array<i32>} : memref<8x8x128xf32, #tpu.memory_space<vmem>>, vector<1x8x128xf32>,
    %c0_50 = arith.constant 0 : index
    %c112 = arith.constant 112 : index
    %95 = vector.load %arg1[%c0_50, %c112] : memref<8x128xbf16, #tpu.memory_space<vmem>>, vector<8x16xbf16>
    %cst_51 = arith.constant dense<0.000000e+00> : vector<8x128xf32>
    %96 = tpu.matmul %95, %0, %cst_51 {dimension_numbers = #tpu.dot_dimension_numbers<[1], [0], [0], [1], [0, 0, 1, 1], [], []>} : vector<8x16xbf16>, vector<16x128xbf16>, vector<8x128xf32> -> vector<8x128xf32>
    %97 = vector.broadcast %2 : vector<1x128xf32> to vector<8x128xf32>
    %98 = arith.addf %96, %97 : vector<8x128xf32>
    %cst_52 = arith.constant 0.000000e+00 : f32
    %99 = vector.broadcast %cst_52 : f32 to vector<8x128xf32>
    %100 = arith.maximumf %98, %99 : vector<8x128xf32>
    %101 = arith.truncf %100 : vector<8x128xf32> to vector<8x128xbf16>
    %cst_53 = arith.constant dense<0.000000e+00> : vector<8x128xf32>
    %102 = tpu.matmul %101, %1, %cst_53 {dimension_numbers = #tpu.dot_dimension_numbers<[1], [0], [0], [1], [0, 0, 1, 1], [], []>} : vector<8x128xbf16>, vector<128x128xbf16>, vector<8x128xf32> -> vector<8x128xf32>
    %103 = vector.broadcast %3 : vector<1x128xf32> to vector<8x128xf32>
    %104 = arith.addf %102, %103 : vector<8x128xf32>
    %c7 = arith.constant 7 : index
    %c0_54 = arith.constant 0 : index
    %c0_55 = arith.constant 0 : index
    %105 = vector.load %arg19[%c7, %c0_54, %c0_55] : memref<8x8x128xf32, #tpu.memory_space<vmem>>, vector<1x8x128xf32>
    %106 = vector.shape_cast %105 : vector<1x8x128xf32> to vector<8x128xf32>
    %107 = vector.shape_cast %104 : vector<8x128xf32> to vector<1x8x128xf32>
    tpu.vector_store %arg19[%c7, %c0_54, %c0_55], %107 {strides = array<i32>} : memref<8x8x128xf32, #tpu.memory_space<vmem>>, vector<1x8x128xf32>,
    %c0_56 = arith.constant 0 : index
    %c0_57 = arith.constant 0 : index
    %108 = vector.load %arg2[%c0_56, %c0_57] : memref<8x1xi32, #tpu.memory_space<vmem>>, vector<8x1xi32>
    %c0_58 = arith.constant 0 : index
    %c0_59 = arith.constant 0 : index
    %109 = vector.load %arg7[%c0_58, %c0_59] : memref<128x128xbf16, #tpu.memory_space<vmem>>, vector<128x128xbf16>
    %cst_60 = arith.constant 0.000000e+00 : bf16
    %110 = vector.broadcast %cst_60 : bf16 to vector<8x128xbf16>
    %cst_61 = arith.constant 0.000000e+00 : f32
    %111 = vector.broadcast %cst_61 : f32 to vector<8x128xf32>
    %c0_i32 = arith.constant 0 : i32
    %112 = arith.index_cast %c0_i32 : i32 to index
    %c0_62 = arith.constant 0 : index
    %c0_63 = arith.constant 0 : index
    %113 = vector.load %arg19[%112, %c0_62, %c0_63] : memref<8x8x128xf32, #tpu.memory_space<vmem>>, vector<1x8x128xf32>
    %114 = vector.shape_cast %113 : vector<1x8x128xf32> to vector<8x128xf32>
    %cst_64 = arith.constant dense<0.000000e+00> : vector<8x128xf32>
    %115 = tpu.matmul %110, %109, %cst_64 {dimension_numbers = #tpu.dot_dimension_numbers<[1], [0], [0], [1], [0, 0, 1, 1], [], []>} : vector<8x128xbf16>, vector<128x128xbf16>, vector<8x128xf32> -> vector<8x128xf32>
    %116 = arith.addf %114, %115 : vector<8x128xf32>
    %117 = math.tanh %116 : vector<8x128xf32>
    %118 = vector.broadcast %c0_i32 : i32 to vector<8x1xi32>
    %119 = arith.cmpi eq, %108, %118 : vector<8x1xi32>
    %120 = vector.shape_cast %119 : vector<8x1xi1> to vector<8x1xi1>
    %121 = vector.broadcast %120 : vector<8x1xi1> to vector<8x128xi1>
    %122 = arith.select %121, %117, %111 : vector<8x128xi1>, vector<8x128xf32>
    %123 = arith.truncf %117 : vector<8x128xf32> to vector<8x128xbf16>
    %c1_i32 = arith.constant 1 : i32
    %124 = arith.index_cast %c1_i32 : i32 to index
    %c0_65 = arith.constant 0 : index
    %c0_66 = arith.constant 0 : index
    %125 = vector.load %arg19[%124, %c0_65, %c0_66] : memref<8x8x128xf32, #tpu.memory_space<vmem>>, vector<1x8x128xf32>
    %126 = vector.shape_cast %125 : vector<1x8x128xf32> to vector<8x128xf32>
    %cst_67 = arith.constant dense<0.000000e+00> : vector<8x128xf32>
    %127 = tpu.matmul %123, %109, %cst_67 {dimension_numbers = #tpu.dot_dimension_numbers<[1], [0], [0], [1], [0, 0, 1, 1], [], []>} : vector<8x128xbf16>, vector<128x128xbf16>, vector<8x128xf32> -> vector<8x128xf32>
    %128 = arith.addf %126, %127 : vector<8x128xf32>
    %129 = math.tanh %128 : vector<8x128xf32>
    %130 = vector.broadcast %c1_i32 : i32 to vector<8x1xi32>
    %131 = arith.cmpi eq, %108, %130 : vector<8x1xi32>
    %132 = vector.shape_cast %131 : vector<8x1xi1> to vector<8x1xi1>
    %133 = vector.broadcast %132 : vector<8x1xi1> to vector<8x128xi1>
    %134 = arith.select %133, %129, %122 : vector<8x128xi1>, vector<8x128xf32>
    %135 = arith.truncf %129 : vector<8x128xf32> to vector<8x128xbf16>
    %c2_i32 = arith.constant 2 : i32
    %136 = arith.index_cast %c2_i32 : i32 to index
    %c0_68 = arith.constant 0 : index
    %c0_69 = arith.constant 0 : index
    %137 = vector.load %arg19[%136, %c0_68, %c0_69] : memref<8x8x128xf32, #tpu.memory_space<vmem>>, vector<1x8x128xf32>
    %138 = vector.shape_cast %137 : vector<1x8x128xf32> to vector<8x128xf32>
    %cst_70 = arith.constant dense<0.000000e+00> : vector<8x128xf32>
    %139 = tpu.matmul %135, %109, %cst_70 {dimension_numbers = #tpu.dot_dimension_numbers<[1], [0], [0], [1], [0, 0, 1, 1], [], []>} : vector<8x128xbf16>, vector<128x128xbf16>, vector<8x128xf32> -> vector<8x128xf32>
    %140 = arith.addf %138, %139 : vector<8x128xf32>
    %141 = math.tanh %140 : vector<8x128xf32>
    %142 = vector.broadcast %c2_i32 : i32 to vector<8x1xi32>
    %143 = arith.cmpi eq, %108, %142 : vector<8x1xi32>
    %144 = vector.shape_cast %143 : vector<8x1xi1> to vector<8x1xi1>
    %145 = vector.broadcast %144 : vector<8x1xi1> to vector<8x128xi1>
    %146 = arith.select %145, %141, %134 : vector<8x128xi1>, vector<8x128xf32>
    %147 = arith.truncf %141 : vector<8x128xf32> to vector<8x128xbf16>
    %c3_i32 = arith.constant 3 : i32
    %148 = arith.index_cast %c3_i32 : i32 to index
    %c0_71 = arith.constant 0 : index
    %c0_72 = arith.constant 0 : index
    %149 = vector.load %arg19[%148, %c0_71, %c0_72] : memref<8x8x128xf32, #tpu.memory_space<vmem>>, vector<1x8x128xf32>
    %150 = vector.shape_cast %149 : vector<1x8x128xf32> to vector<8x128xf32>
    %cst_73 = arith.constant dense<0.000000e+00> : vector<8x128xf32>
    %151 = tpu.matmul %147, %109, %cst_73 {dimension_numbers = #tpu.dot_dimension_numbers<[1], [0], [0], [1], [0, 0, 1, 1], [], []>} : vector<8x128xbf16>, vector<128x128xbf16>, vector<8x128xf32> -> vector<8x128xf32>
    %152 = arith.addf %150, %151 : vector<8x128xf32>
    %153 = math.tanh %152 : vector<8x128xf32>
    %154 = vector.broadcast %c3_i32 : i32 to vector<8x1xi32>
    %155 = arith.cmpi eq, %108, %154 : vector<8x1xi32>
    %156 = vector.shape_cast %155 : vector<8x1xi1> to vector<8x1xi1>
    %157 = vector.broadcast %156 : vector<8x1xi1> to vector<8x128xi1>
    %158 = arith.select %157, %153, %146 : vector<8x128xi1>, vector<8x128xf32>
    %159 = arith.truncf %153 : vector<8x128xf32> to vector<8x128xbf16>
    %c4_i32 = arith.constant 4 : i32
    %160 = arith.index_cast %c4_i32 : i32 to index
    %c0_74 = arith.constant 0 : index
    %c0_75 = arith.constant 0 : index
    %161 = vector.load %arg19[%160, %c0_74, %c0_75] : memref<8x8x128xf32, #tpu.memory_space<vmem>>, vector<1x8x128xf32>
    %162 = vector.shape_cast %161 : vector<1x8x128xf32> to vector<8x128xf32>
    %cst_76 = arith.constant dense<0.000000e+00> : vector<8x128xf32>
    %163 = tpu.matmul %159, %109, %cst_76 {dimension_numbers = #tpu.dot_dimension_numbers<[1], [0], [0], [1], [0, 0, 1, 1], [], []>} : vector<8x128xbf16>, vector<128x128xbf16>, vector<8x128xf32> -> vector<8x128xf32>
    %164 = arith.addf %162, %163 : vector<8x128xf32>
    %165 = math.tanh %164 : vector<8x128xf32>
    %166 = vector.broadcast %c4_i32 : i32 to vector<8x1xi32>
    %167 = arith.cmpi eq, %108, %166 : vector<8x1xi32>
    %168 = vector.shape_cast %167 : vector<8x1xi1> to vector<8x1xi1>
    %169 = vector.broadcast %168 : vector<8x1xi1> to vector<8x128xi1>
    %170 = arith.select %169, %165, %158 : vector<8x128xi1>, vector<8x128xf32>
    %171 = arith.truncf %165 : vector<8x128xf32> to vector<8x128xbf16>
    %c5_i32 = arith.constant 5 : i32
    %172 = arith.index_cast %c5_i32 : i32 to index
    %c0_77 = arith.constant 0 : index
    %c0_78 = arith.constant 0 : index
    %173 = vector.load %arg19[%172, %c0_77, %c0_78] : memref<8x8x128xf32, #tpu.memory_space<vmem>>, vector<1x8x128xf32>
    %174 = vector.shape_cast %173 : vector<1x8x128xf32> to vector<8x128xf32>
    %cst_79 = arith.constant dense<0.000000e+00> : vector<8x128xf32>
    %175 = tpu.matmul %171, %109, %cst_79 {dimension_numbers = #tpu.dot_dimension_numbers<[1], [0], [0], [1], [0, 0, 1, 1], [], []>} : vector<8x128xbf16>, vector<128x128xbf16>, vector<8x128xf32> -> vector<8x128xf32>
    %176 = arith.addf %174, %175 : vector<8x128xf32>
    %177 = math.tanh %176 : vector<8x128xf32>
    %178 = vector.broadcast %c5_i32 : i32 to vector<8x1xi32>
    %179 = arith.cmpi eq, %108, %178 : vector<8x1xi32>
    %180 = vector.shape_cast %179 : vector<8x1xi1> to vector<8x1xi1>
    %181 = vector.broadcast %180 : vector<8x1xi1> to vector<8x128xi1>
    %182 = arith.select %181, %177, %170 : vector<8x128xi1>, vector<8x128xf32>
    %183 = arith.truncf %177 : vector<8x128xf32> to vector<8x128xbf16>
    %c6_i32 = arith.constant 6 : i32
    %184 = arith.index_cast %c6_i32 : i32 to index
    %c0_80 = arith.constant 0 : index
    %c0_81 = arith.constant 0 : index
    %185 = vector.load %arg19[%184, %c0_80, %c0_81] : memref<8x8x128xf32, #tpu.memory_space<vmem>>, vector<1x8x128xf32>
    %186 = vector.shape_cast %185 : vector<1x8x128xf32> to vector<8x128xf32>
    %cst_82 = arith.constant dense<0.000000e+00> : vector<8x128xf32>
    %187 = tpu.matmul %183, %109, %cst_82 {dimension_numbers = #tpu.dot_dimension_numbers<[1], [0], [0], [1], [0, 0, 1, 1], [], []>} : vector<8x128xbf16>, vector<128x128xbf16>, vector<8x128xf32> -> vector<8x128xf32>
    %188 = arith.addf %186, %187 : vector<8x128xf32>
    %189 = math.tanh %188 : vector<8x128xf32>
    %190 = vector.broadcast %c6_i32 : i32 to vector<8x1xi32>
    %191 = arith.cmpi eq, %108, %190 : vector<8x1xi32>
    %192 = vector.shape_cast %191 : vector<8x1xi1> to vector<8x1xi1>
    %193 = vector.broadcast %192 : vector<8x1xi1> to vector<8x128xi1>
    %194 = arith.select %193, %189, %182 : vector<8x128xi1>, vector<8x128xf32>
    %195 = arith.truncf %189 : vector<8x128xf32> to vector<8x128xbf16>
    %c7_i32 = arith.constant 7 : i32
    %196 = arith.index_cast %c7_i32 : i32 to index
    %c0_83 = arith.constant 0 : index
    %c0_84 = arith.constant 0 : index
    %197 = vector.load %arg19[%196, %c0_83, %c0_84] : memref<8x8x128xf32, #tpu.memory_space<vmem>>, vector<1x8x128xf32>
    %198 = vector.shape_cast %197 : vector<1x8x128xf32> to vector<8x128xf32>
    %cst_85 = arith.constant dense<0.000000e+00> : vector<8x128xf32>
    %199 = tpu.matmul %195, %109, %cst_85 {dimension_numbers = #tpu.dot_dimension_numbers<[1], [0], [0], [1], [0, 0, 1, 1], [], []>} : vector<8x128xbf16>, vector<128x128xbf16>, vector<8x128xf32> -> vector<8x128xf32>
    %200 = arith.addf %198, %199 : vector<8x128xf32>
    %201 = math.tanh %200 : vector<8x128xf32>
    %202 = vector.broadcast %c7_i32 : i32 to vector<8x1xi32>
    %203 = arith.cmpi eq, %108, %202 : vector<8x1xi32>
    %204 = vector.shape_cast %203 : vector<8x1xi1> to vector<8x1xi1>
    %205 = vector.broadcast %204 : vector<8x1xi1> to vector<8x128xi1>
    %206 = arith.select %205, %201, %194 : vector<8x128xi1>, vector<8x128xf32>
    %207 = arith.truncf %201 : vector<8x128xf32> to vector<8x128xbf16>
    %c8_i32 = arith.constant 8 : i32
    %c0_86 = arith.constant 0 : index
    %c0_87 = arith.constant 0 : index
    %208 = vector.load %arg3[%c0_86, %c0_87] : memref<8x16xbf16, #tpu.memory_space<vmem>>, vector<8x16xbf16>
    %c0_88 = arith.constant 0 : index
    %c0_89 = arith.constant 0 : index
    %209 = vector.load %arg9[%c0_88, %c0_89] : memref<16x128xbf16, #tpu.memory_space<vmem>>, vector<16x128xbf16>
    %cst_90 = arith.constant dense<0.000000e+00> : vector<8x128xf32>
    %210 = tpu.matmul %208, %209, %cst_90 {dimension_numbers = #tpu.dot_dimension_numbers<[1], [0], [0], [1], [0, 0, 1, 1], [], []>} : vector<8x16xbf16>, vector<16x128xbf16>, vector<8x128xf32> -> vector<8x128xf32>
    %c0_91 = arith.constant 0 : index
    %c0_92 = arith.constant 0 : index
    %211 = vector.load %arg10[%c0_91, %c0_92] : memref<1x128xf32, #tpu.memory_space<vmem>>, vector<1x128xf32>
    %212 = vector.broadcast %211 : vector<1x128xf32> to vector<8x128xf32>
    %213 = arith.addf %210, %212 : vector<8x128xf32>
    %cst_93 = arith.constant 0.000000e+00 : f32
    %214 = vector.broadcast %cst_93 : f32 to vector<8x128xf32>
    %215 = arith.maximumf %213, %214 : vector<8x128xf32>
    %216 = arith.truncf %215 : vector<8x128xf32> to vector<8x128xbf16>
    %c0_94 = arith.constant 0 : index
    %c0_95 = arith.constant 0 : index
    %217 = vector.load %arg11[%c0_94, %c0_95] : memref<128x128xbf16, #tpu.memory_space<vmem>>, vector<128x128xbf16>
    %cst_96 = arith.constant dense<0.000000e+00> : vector<8x128xf32>
    %218 = tpu.matmul %216, %217, %cst_96 {dimension_numbers = #tpu.dot_dimension_numbers<[1], [0], [0], [1], [0, 0, 1, 1], [], []>} : vector<8x128xbf16>, vector<128x128xbf16>, vector<8x128xf32> -> vector<8x128xf32>
    %c0_97 = arith.constant 0 : index
    %c0_98 = arith.constant 0 : index
    %219 = vector.load %arg12[%c0_97, %c0_98] : memref<1x128xf32, #tpu.memory_space<vmem>>, vector<1x128xf32>
    %220 = vector.broadcast %219 : vector<1x128xf32> to vector<8x128xf32>
    %221 = arith.addf %218, %220 : vector<8x128xf32>
    %cst_99 = arith.constant 0.000000e+00 : f32
    %222 = vector.broadcast %cst_99 : f32 to vector<8x128xf32>
    %223 = arith.maximumf %221, %222 : vector<8x128xf32>
    %224 = arith.truncf %206 : vector<8x128xf32> to vector<8x128xbf16>
    %c0_100 = arith.constant 0 : index
    %c0_101 = arith.constant 0 : index
    %225 = vector.load %arg13[%c0_100, %c0_101] : memref<128x128xbf16, #tpu.memory_space<vmem>>, vector<128x128xbf16>
    %cst_102 = arith.constant dense<0.000000e+00> : vector<8x128xf32>
    %226 = tpu.matmul %224, %225, %cst_102 {dimension_numbers = #tpu.dot_dimension_numbers<[1], [0], [0], [1], [0, 0, 1, 1], [], []>} : vector<8x128xbf16>, vector<128x128xbf16>, vector<8x128xf32> -> vector<8x128xf32>
    %227 = arith.truncf %223 : vector<8x128xf32> to vector<8x128xbf16>
    %c0_103 = arith.constant 0 : index
    %c0_104 = arith.constant 0 : index
    %228 = vector.load %arg14[%c0_103, %c0_104] : memref<128x128xbf16, #tpu.memory_space<vmem>>, vector<128x128xbf16>
    %cst_105 = arith.constant dense<0.000000e+00> : vector<8x128xf32>
    %229 = tpu.matmul %227, %228, %cst_105 {dimension_numbers = #tpu.dot_dimension_numbers<[1], [0], [0], [1], [0, 0, 1, 1], [], []>} : vector<8x128xbf16>, vector<128x128xbf16>, vector<8x128xf32> -> vector<8x128xf32>
    %230 = arith.addf %226, %229 : vector<8x128xf32>
    %c0_106 = arith.constant 0 : index
    %c0_107 = arith.constant 0 : index
    %231 = vector.load %arg15[%c0_106, %c0_107] : memref<1x128xf32, #tpu.memory_space<vmem>>, vector<1x128xf32>
    %232 = vector.broadcast %231 : vector<1x128xf32> to vector<8x128xf32>
    %233 = arith.addf %230, %232 : vector<8x128xf32>
    %cst_108 = arith.constant 0.000000e+00 : f32
    %234 = vector.broadcast %cst_108 : f32 to vector<8x128xf32>
    %235 = arith.maximumf %233, %234 : vector<8x128xf32>
    %236 = arith.truncf %235 : vector<8x128xf32> to vector<8x128xbf16>
    %c0_109 = arith.constant 0 : index
    %c0_110 = arith.constant 0 : index
    %237 = vector.load %arg16[%c0_109, %c0_110] : memref<128x3xbf16, #tpu.memory_space<vmem>>, vector<128x3xbf16>
    %cst_111 = arith.constant dense<0.000000e+00> : vector<8x3xf32>
    %238 = tpu.matmul %236, %237, %cst_111 {dimension_numbers = #tpu.dot_dimension_numbers<[1], [0], [0], [1], [0, 0, 1, 1], [], []>} : vector<8x128xbf16>, vector<128x3xbf16>, vector<8x3xf32> -> vector<8x3xf32>
    %c0_112 = arith.constant 0 : index
    %c0_113 = arith.constant 0 : index
    %239 = vector.load %arg17[%c0_112, %c0_113] : memref<1x3xf32, #tpu.memory_space<vmem>>, vector<1x3xf32>
    %240 = vector.broadcast %239 : vector<1x3xf32> to vector<8x3xf32>
    %241 = arith.addf %238, %240 : vector<8x3xf32>
    %242 = math.tanh %241 : vector<8x3xf32>
    %cst_114 = arith.constant 2.000000e+00 : f32
    %243 = vector.broadcast %cst_114 : f32 to vector<8x3xf32>
    %244 = arith.mulf %243, %242 : vector<8x3xf32>
    %c0_115 = arith.constant 0 : index
    %c0_116 = arith.constant 0 : index
    %245 = vector.load %arg18[%c0_115, %c0_116] : memref<8x3xf32, #tpu.memory_space<vmem>>, vector<8x3xf32>
    tpu.vector_store %arg18[%c0_115, %c0_116], %244 {strides = array<i32>} : memref<8x3xf32, #tpu.memory_space<vmem>>, vector<8x3xf32>,
    return
  }
  func.func @transform_0(%arg0: i32) -> (i32, i32) {
    %c0_i32 = arith.constant 0 : i32
    %c0_i32_0 = arith.constant 0 : i32
    return %arg0, %c0_i32 : i32, i32
  }
  func.func @transform_1(%arg0: i32) -> (i32, i32) {
    %c0_i32 = arith.constant 0 : i32
    %c0_i32_0 = arith.constant 0 : i32
    return %arg0, %c0_i32 : i32, i32
  }
  func.func @transform_2(%arg0: i32) -> (i32, i32) {
    %c0_i32 = arith.constant 0 : i32
    %c0_i32_0 = arith.constant 0 : i32
    return %arg0, %c0_i32 : i32, i32
  }
  func.func @transform_3(%arg0: i32) -> (i32, i32) {
    %c0_i32 = arith.constant 0 : i32
    %c0_i32_0 = arith.constant 0 : i32
    %c0_i32_1 = arith.constant 0 : i32
    return %c0_i32, %c0_i32_0 : i32, i32
  }
  func.func @transform_4(%arg0: i32) -> (i32, i32) {
    %c0_i32 = arith.constant 0 : i32
    %c0_i32_0 = arith.constant 0 : i32
    %c0_i32_1 = arith.constant 0 : i32
    return %c0_i32, %c0_i32_0 : i32, i32
  }
  func.func @transform_5(%arg0: i32) -> (i32, i32) {
    %c0_i32 = arith.constant 0 : i32
    %c0_i32_0 = arith.constant 0 : i32
    %c0_i32_1 = arith.constant 0 : i32
    return %c0_i32, %c0_i32_0 : i32, i32
  }
  func.func @transform_6(%arg0: i32) -> (i32, i32) {
    %c0_i32 = arith.constant 0 : i32
    %c0_i32_0 = arith.constant 0 : i32
    %c0_i32_1 = arith.constant 0 : i32
    return %c0_i32, %c0_i32_0 : i32, i32
  }
  func.func @transform_7(%arg0: i32) -> (i32, i32) {
    %c0_i32 = arith.constant 0 : i32
    %c0_i32_0 = arith.constant 0 : i32
    %c0_i32_1 = arith.constant 0 : i32
    return %c0_i32, %c0_i32_0 : i32, i32
  }
  func.func @transform_8(%arg0: i32) -> (i32, i32) {
    %c0_i32 = arith.constant 0 : i32
    %c0_i32_0 = arith.constant 0 : i32
    %c0_i32_1 = arith.constant 0 : i32
    return %c0_i32, %c0_i32_0 : i32, i32
  }
  func.func @transform_9(%arg0: i32) -> (i32, i32) {
    %c0_i32 = arith.constant 0 : i32
    %c0_i32_0 = arith.constant 0 : i32
    %c0_i32_1 = arith.constant 0 : i32
    return %c0_i32, %c0_i32_0 : i32, i32
  }
  func.func @transform_10(%arg0: i32) -> (i32, i32) {
    %c0_i32 = arith.constant 0 : i32
    %c0_i32_0 = arith.constant 0 : i32
    %c0_i32_1 = arith.constant 0 : i32
    return %c0_i32, %c0_i32_0 : i32, i32
  }
  func.func @transform_11(%arg0: i32) -> (i32, i32) {
    %c0_i32 = arith.constant 0 : i32
    %c0_i32_0 = arith.constant 0 : i32
    %c0_i32_1 = arith.constant 0 : i32
    return %c0_i32, %c0_i32_0 : i32, i32
  }
  func.func @transform_12(%arg0: i32) -> (i32, i32) {
    %c0_i32 = arith.constant 0 : i32
    %c0_i32_0 = arith.constant 0 : i32
    %c0_i32_1 = arith.constant 0 : i32
    return %c0_i32, %c0_i32_0 : i32, i32
  }
  func.func @transform_13(%arg0: i32) -> (i32, i32) {
    %c0_i32 = arith.constant 0 : i32
    %c0_i32_0 = arith.constant 0 : i32
    %c0_i32_1 = arith.constant 0 : i32
    return %c0_i32, %c0_i32_0 : i32, i32
  }
  func.func @transform_14(%arg0: i32) -> (i32, i32) {
    %c0_i32 = arith.constant 0 : i32
    %c0_i32_0 = arith.constant 0 : i32
    %c0_i32_1 = arith.constant 0 : i32
    return %c0_i32, %c0_i32_0 : i32, i32
  }
  func.func @transform_15(%arg0: i32) -> (i32, i32) {
    %c0_i32 = arith.constant 0 : i32
    %c0_i32_0 = arith.constant 0 : i32
    %c0_i32_1 = arith.constant 0 : i32
    return %c0_i32, %c0_i32_0 : i32, i32
  }
  func.func @transform_16(%arg0: i32) -> (i32, i32) {
    %c0_i32 = arith.constant 0 : i32
    %c0_i32_0 = arith.constant 0 : i32
    %c0_i32_1 = arith.constant 0 : i32
    return %c0_i32, %c0_i32_0 : i32, i32
  }
  func.func @transform_17(%arg0: i32) -> (i32, i32) {
    %c0_i32 = arith.constant 0 : i32
    %c0_i32_0 = arith.constant 0 : i32
    return %arg0, %c0_i32 : i32, i32
  }
}

</mosaic_0001>

<bundles_post_ra>
// kernel: tpu_custom_call.1
= control target key start
LH: loop header
LB: loop body
LE: loop exit
PB: predicated region body
PF: predicated region fallthrough
CT: control target
= control target key end

     0   :  { %s3605_s0 = inlined_call_operand.vmem [shape: bf16[8,128], index: 0, kind: input, shape index: {}]   ;;  %s3606_s1 = inlined_call_operand.vmem [shape: s32[8,1], index: 1, kind: input, shape index: {}]   ;;  %s3607_s2 = inlined_call_operand.hbm [shape: bf16[8,16], index: 2, kind: input, shape index: {}]   ;;  %s3608_s3 = inlined_call_operand.vmem [shape: bf16[16,128], index: 3, kind: input, shape index: {}]   ;;  %s3609_s4 = inlined_call_operand.hbm [shape: f32[1,128], index: 4, kind: input, shape index: {}]   ;;  %s3610_s5 = inlined_call_operand.vmem [shape: bf16[128,128], index: 5, kind: input, shape index: {}]   ;;  %s3611_s6 = inlined_call_operand.hbm [shape: bf16[128,128], index: 6, kind: input, shape index: {}]   ;;  %s3612_s7 = inlined_call_operand.vmem [shape: f32[1,128], index: 7, kind: input, shape index: {}]   ;;  %s3613_s8 = inlined_call_operand.vmem [shape: bf16[16,128], index: 8, kind: input, shape index: {}]   ;;  %s3614_s9 = inlined_call_operand.vmem [shape: f32[1,128], index: 9, kind: input, shape index: {}]   ;;  %s3615_s10 = inlined_call_operand.hbm [shape: bf16[128,128], index: 10, kind: input, shape index: {}]   ;;  %s3616_s11 = inlined_call_operand.vmem [shape: f32[1,128], index: 11, kind: input, shape index: {}]   ;;  %s3617_s12 = inlined_call_operand.hbm [shape: bf16[128,128], index: 12, kind: input, shape index: {}]   ;;  %s3618_s13 = inlined_call_operand.hbm [shape: bf16[128,128], index: 13, kind: input, shape index: {}]   ;;  %s3619_s14 = inlined_call_operand.vmem [shape: f32[1,128], index: 14, kind: input, shape index: {}]   ;;  %s3620_s15 = inlined_call_operand.vmem [shape: bf16[128,3], index: 15, kind: input, shape index: {}]   ;;  %s3621_s16 = inlined_call_operand.vmem [shape: f32[1,3], index: 16, kind: input, shape index: {}]   ;;  %s3622_s17 = inlined_call_operand.vmem [shape: f32[8,3], index: 17, kind: output, shape index: {}]  }
   0x1   :  { %3624 = sst [smem:[#allocation17_spill]] %s3605_s0 }
   0x2   :  { %3625 = sst [smem:[#allocation18_spill]] %s3606_s1 }
   0x3   :  { %22 = vsyncpa [#allocation4], 0 }
   0x4   :  { %23 = vsyncpa [#allocation6], 0 }
   0x5   :  { %24 = vsyncpa [#allocation9], 0 }
   0x6   :  { %25 = vsyncpa [#allocation12], 0  ;;  %s2894_s24 = smov [#allocation5]  }
   0x7   :  { %s48_s25 = sshll.u32 %s2894_s24, 4  ;;  %s49_s25 = int_to_ptr.vmem [resolvable:$true] %s48_s25 }
   0x8   :  { %s2774_s26 = scalar_lea.vmem %s49_s25, 16  ;;  %s2778_s27 = scalar_lea.vmem %s49_s25, 32 }
   0x9   :  { %p2775_p0 = scmp.ne.s32.totalorder %s49_s25, %s2774_s26  ;;  %p2779_p1 = scmp.lt.s32.totalorder %s49_s25, %s49_s25 }
   0xa   :  { %p2780_p2 = scmp.lt.s32.totalorder %s2778_s27, %s2774_s26 }
   0xc   :  { %p2781_p3 = por %p2780_p2, %p2779_p1 }
   0xe   :  { %p2782_p4 = pnand %p2781_p3, %p2775_p0 }
  0x10   :  { %2785 = shalt.err (!%p2782_p4)
}
  0x11   :  { %51 = dma.hbm_to_vmem [thread:$0]  %s3609_s4, 16, %s49_s25, [#allocation6]  }
  0x12   :  { %s2895_s0 = smov [#allocation8]   ;;  %s2896_s18 = smov [#allocation3]  }
  0x13   :  { %s77_s30 = sshll.u32 %s2895_s0, 4  ;;  %s36_s19 = sshll.u32 %s2896_s18, 4  ;;  %s78_s30 = int_to_ptr.vmem [resolvable:$true] %s77_s30  ;;  %s37_s19 = int_to_ptr.vmem [resolvable:$true] %s36_s19 }
  0x14   :  { %s2794_s1 = scalar_lea.vmem %s78_s30, 1024  ;;  %p2799_p6 = scmp.lt.s32.totalorder %s78_s30, %s78_s30 }
  0x15   :  { %p2795_p5 = scmp.ne.s32.totalorder %s78_s30, %s2794_s1  ;;  %p2800_p7 = scmp.lt.s32.totalorder %s2794_s1, %s2794_s1 }
  0x17   :  { %p2801_p8 = por %p2800_p7, %p2799_p6 }
  0x19   :  { %p2802_p9 = pnand %p2801_p8, %p2795_p5 }
  0x1b   :  { %2805 = shalt.err (!%p2802_p9)
}
  0x1c   :  { %s2897_s20 = smov 64   ;;  %s2898_s21 = smov 4  }
  0x1d   :  { %83 = dma.hbm_to_vmem [thread:$0]  %s3615_s10, 1024, %s78_s30, [#allocation9], %s2897_s20, %s2897_s20, %s2898_s21  }
  0x1e   :  { %s2814_s4 = scalar_lea.vmem %s37_s19, 64  ;;  %p2819_p11 = scmp.lt.s32.totalorder %s37_s19, %s37_s19 }
  0x1f   :  { %p2815_p10 = scmp.ne.s32.totalorder %s37_s19, %s2814_s4  ;;  %p2820_p12 = scmp.lt.s32.totalorder %s2814_s4, %s2814_s4 }
  0x21   :  { %p2821_p13 = por %p2820_p12, %p2819_p11 }
  0x23   :  { %p2822_p0 = pnand %p2821_p13, %p2815_p10 }
  0x25   :  { %2825 = shalt.err (!%p2822_p0)
}
  0x26   :  { %39 = dma.hbm_to_vmem [thread:$0]  %s3607_s2, 64, %s37_s19, [#allocation4]  }
  0x27   :  { %s2899_s26 = smov [#allocation7]   ;;  %s2900_s28 = smov [#allocation10]  }
  0x28   :  { %s59_s27 = sshll.u32 %s2899_s26, 4  ;;  %s91_s29 = sshll.u32 %s2900_s28, 4  ;;  %s60_s27 = int_to_ptr.vmem [resolvable:$true] %s59_s27  ;;  %s92_s29 = int_to_ptr.vmem [resolvable:$true] %s91_s29 }
  0x29   :  { %s2834_s0 = scalar_lea.vmem %s60_s27, 1024  ;;  %p2839_p2 = scmp.lt.s32.totalorder %s60_s27, %s60_s27 }
  0x2a   :  { %p2835_p1 = scmp.ne.s32.totalorder %s60_s27, %s2834_s0  ;;  %p2840_p3 = scmp.lt.s32.totalorder %s2834_s0, %s2834_s0 }
  0x2c   :  { %p2841_p4 = por %p2840_p3, %p2839_p2 }
  0x2e   :  { %p2842_p5 = pnand %p2841_p4, %p2835_p1 }
  0x30   :  { %2845 = shalt.err (!%p2842_p5)
}
  0x31   :  { %65 = dma.hbm_to_vmem [thread:$0]  %s3611_s6, 1024, %s60_s27, [#allocation6], %s2897_s20, %s2897_s20, %s2898_s21  }
  0x32   :  { %s2854_s2 = scalar_lea.vmem %s92_s29, 1024  ;;  %p2859_p7 = scmp.lt.s32.totalorder %s92_s29, %s92_s29 }
  0x33   :  { %p2855_p6 = scmp.ne.s32.totalorder %s92_s29, %s2854_s2  ;;  %p2860_p8 = scmp.lt.s32.totalorder %s2854_s2, %s2854_s2 }
  0x35   :  { %p2861_p9 = por %p2860_p8, %p2859_p7 }
  0x37   :  { %p2862_p10 = pnand %p2861_p9, %p2855_p6 }
  0x39   :  { %2865 = shalt.err (!%p2862_p10)
}
  0x3a   :  { %97 = dma.hbm_to_vmem [thread:$0]  %s3617_s12, 1024, %s92_s29, [#allocation9], %s2897_s20, %s2897_s20, %s2898_s21  }
  0x3b   :  { %s2901_s1 = smov [#allocation11]  }
  0x3c   :  { %s103_s22 = sshll.u32 %s2901_s1, 4  ;;  %s104_s22 = int_to_ptr.vmem [resolvable:$true] %s103_s22 }
  0x3d   :  { %s2874_s23 = scalar_lea.vmem %s104_s22, 1024  ;;  %p2879_p12 = scmp.lt.s32.totalorder %s104_s22, %s104_s22 }
  0x3e   :  { %p2875_p11 = scmp.ne.s32.totalorder %s104_s22, %s2874_s23  ;;  %p2880_p13 = scmp.lt.s32.totalorder %s2874_s23, %s2874_s23 }
  0x40   :  { %p2881_p0 = por %p2880_p13, %p2879_p12 }
  0x42   :  { %p2882_p1 = pnand %p2881_p0, %p2875_p11 }
  0x44   :  { %2885 = shalt.err (!%p2882_p1)
}
  0x45   :  { %109 = dma.hbm_to_vmem [thread:$0]  %s3618_s13, 1024, %s104_s22, [#allocation12], %s2897_s20, %s2897_s20, %s2898_s21  }
  0x46   :  { %2886 = dma.done.wait [#allocation4], 64  }
  0x47   :  { %2887 = vsyncadd [#allocation4], 4294967232 }
  0x48   :  { %2888 = dma.done.wait [#allocation6], 1040  }
  0x49   :  { %2889 = vsyncadd [#allocation6], 4294966256 }
  0x4a   :  { %2890 = dma.done.wait [#allocation9], 2048  }
  0x4b   :  { %2891 = vsyncadd [#allocation9], 4294965248 }
  0x4c   :  { %2892 = dma.done.wait [#allocation12], 1024  }
  0x4d   :  { %2893 = vsyncadd [#allocation12], 4294966272  ;;  %v2902_v0 = vmov 0.0   ;;  %vm2903_vm0 = vmmov 0   ;;  %vm168_vm1 = vcmask 130048   ;;  %v3040_v1 = vld [vmem:[%s3608_s3] sm:$0xff]  }
  0x4e   :  { %2218 = vmatprep.subr.bf16.mxu0 %v2902_v0  ;;  %2220 = vmatprep.mubr.msk.bf16.mxu0 %vm2903_vm0, %v2902_v0  ;;  %s3626_s25 = sld [smem:[#allocation17_spill]]  ;;  %s2904_s0 = smov 96   ;;  %v3055_v5 = vld [vmem:[%s3610_s5 + $0x38] sm:$0xff]   ;;  %v3063_v6 = vld [vmem:[%s3610_s5 + $0x30] sm:$0xff]   ;;  %v3074_v7 = vld [vmem:[%s3610_s5 + $0x28] sm:$0xff]  }
  0x4f   :  { %2224 = vmatprep.subr.bf16.mxu1 %v2902_v0  ;;  %2240 = vmatprep.mubr.msk.bf16.mxu1 %vm2903_vm0, %v2902_v0  ;;  %s2905_s18 = smov 112   ;;  %v3080_v8 = vld [vmem:[%s3610_s5 + $0x20] sm:$0xff]   ;;  %v3087_v9 = vld [vmem:[%s3610_s5 + $0x18] sm:$0xff]   ;;  %v3094_v10 = vld [vmem:[%s3610_s5 + $0x10] sm:$0xff]   ;;  %s2906_s30 = smov 80  }
  0x50   :  { %2219 = vmatpush3.bf16.msra.mxu0 %v3040_v1  ;;  %2225 = vmatpush3.bf16.msra.mxu1 %v3055_v5  ;;  %v3101_v11 = vld [vmem:[%s3610_s5 + $0x8] sm:$0xff]   ;;  %v3110_v12 = vld [vmem:[%s3610_s5] sm:$0xff]   ;;  %s2908_s19 = smov 32   ;;  %s2909_s23 = smov 16  }
  0x51   :  { %2244 = vmatprep.subr.bf16.mxu0 %v2902_v0  ;;  %2226 = vmatprep.subr.bf16.mxu1 %v2902_v0  ;;  %v3140_v17 = vld [vmem:[#allocation5] ss:$0 sm:$0xff]  ;;  %s3627_s4 = sld [smem:[#allocation18_spill]] }
  0x54   :  { %v155_v2 = vld [vmem:[%s3626_s25] sm:$0xf]  ;;  %2227 = vmatpush3.bf16.msra.mxu1 %v3063_v6 }
  0x55   :  { %v2692_v3 = vld [vmem:[%s3626_s25] ss:$0 sps:$4 sm:$0xff]   ;;  %2221 = vmatmul.mubr.msk.bf16.vlgmr.msra.gmra.mxu0 %vm168_vm1, %v155_v2  ;;  %2228 = vmatprep.subr.bf16.mxu1 %v2902_v0 }
  0x56   :  { %v2693_v4 = vld [vmem:[%s3626_s25] ss:$0 sps:$4 sm:$0xff]   ;;  %406 = vrot.lane.b32.xlu0 %v2692_v3, %s2904_s0  ;;  %2245 = vmatpush3.bf16.msra.mxu0 %v3040_v1 }
  0x57   :  { %2246 = vmatprep.mubr.msk.bf16.mxu0 %vm2903_vm0, %v2902_v0  ;;  %2250 = vmatprep.subr.bf16.mxu0 %v2902_v0  ;;  %v2702_v13 = vld [vmem:[%s3626_s25] ss:$0 sps:$4 sm:$0xff]  }
  0x58   :  { %2229 = vmatpush3.bf16.msra.mxu1 %v3074_v7  ;;  %592 = vrot.lane.b32.xlu1 %v2702_v13, %s2897_s20  ;;  %v2703_v14 = vld [vmem:[%s3626_s25] ss:$0 sps:$4 sm:$0xff]  }
  0x59   :  { %2230 = vmatprep.subr.bf16.mxu1 %v2902_v0  ;;  %v2704_v25 = vld [vmem:[%s3626_s25] ss:$0 sps:$4 sm:$0xff]  }
  0x5a   :  { %313 = vrot.lane.b32.xlu0 %v2693_v4, %s2905_s18  ;;  %v2705_v26 = vld [vmem:[%s3626_s25] ss:$0 sps:$4 sm:$0xff]   ;;  %s2907_s18 = smov 48  }
  0x5b   :  { %v2706_v47 = vld [vmem:[%s3626_s25] ss:$0 sps:$4 sm:$0xff]  }
  0x5c   :  { %2231 = vmatpush3.bf16.msra.mxu1 %v3080_v8  ;;  %499 = vrot.lane.b32.xlu1 %v2703_v14, %s2906_s30 }
  0x5d   :  { %2232 = vmatprep.subr.bf16.mxu1 %v2902_v0 }
  0x5e   :  { %778 = vrot.lane.b32.xlu0 %v2705_v26, %s2908_s19  ;;  %v3285_v26 = vld [vmem:[%s3627_s4] sm:$0xff] }
  0x5f   :  { %vm1068_vm2 = vcmp.eq.s32.totalorder %v3285_v26, 0  ;;  %vm1119_vm3 = vcmp.eq.s32.totalorder %v3285_v26, 1  ;;  %vm1170_vm4 = vcmp.eq.s32.totalorder %v3285_v26, 2  ;;  %vm1221_vm7 = vcmp.eq.s32.totalorder %v3285_v26, 3 }
  0x60   :  { %2233 = vmatpush3.bf16.msra.mxu1 %v3087_v9  ;;  %685 = vrot.lane.b32.xlu1 %v2704_v25, %s2907_s18  ;;  %vm1272_vm9 = vcmp.eq.s32.totalorder %v3285_v26, 4  ;;  %vm1323_vm11 = vcmp.eq.s32.totalorder %v3285_v26, 5  ;;  %vm1374_vm13 = vcmp.eq.s32.totalorder %v3285_v26, 6  ;;  %vm1425_vm15 = vcmp.eq.s32.totalorder %v3285_v26, 7  ;;  %v1982_v26 = vld [vmem:[%s3614_s9] ss:$0 sm:$0xff] }
  0x61   :  { %2234 = vmatprep.subr.bf16.mxu1 %v2902_v0 }
  0x62   :  { %871 = vrot.lane.b32.xlu0 %v2706_v47, %s2909_s23 }
  0x64   :  { %2235 = vmatpush3.bf16.msra.mxu1 %v3094_v10 }
  0x65   :  { %2236 = vmatprep.subr.bf16.mxu1 %v2902_v0 }
  0x68   :  { %2237 = vmatpush3.bf16.msra.mxu1 %v3101_v11 }
  0x69   :  { %2238 = vmatprep.subr.bf16.mxu1 %v2902_v0 }
  0x6c   :  { %2239 = vmatpush3.bf16.msra.mxu1 %v3110_v12 }
  0x6d   :  { %2270 = vmatprep.subr.bf16.mxu1 %v2902_v0 }
  0xc8   :  { %v407_v15 = vpop.permute.xlu0 %406 }
  0xca   :  { %v593_v34 = vpop.permute.xlu1 %592 }
  0xcc   :  { %v314_v16 = vpop.permute.xlu0 %313 }
  0xcd   :  { %2247 = vmatmul.mubr.msk.bf16.vlgmr.msra.gmra.mxu0 %vm168_vm1, %v314_v16 }
  0xce   :  { %2251 = vmatpush3.bf16.msra.mxu0 %v3055_v5  ;;  %2266 = vmatprep.mubr.msk.bf16.mxu0 %vm2903_vm0, %v2902_v0  ;;  %v500_v35 = vpop.permute.xlu1 %499 }
  0xcf   :  { %2252 = vmatprep.subr.bf16.mxu0 %v2902_v0 }
  0xd2   :  { %2253 = vmatpush3.bf16.msra.mxu0 %v3063_v6  ;;  %v686_v59 = vpop.permute.xlu1 %685 }
  0xd3   :  { %2254 = vmatprep.subr.bf16.mxu0 %v2902_v0 }
  0xd6   :  { %2255 = vmatpush3.bf16.msra.mxu0 %v3074_v7 }
  0xd7   :  { %2256 = vmatprep.subr.bf16.mxu0 %v2902_v0 }
  0xda   :  { %2257 = vmatpush3.bf16.msra.mxu0 %v3080_v8 }
  0xdb   :  { %2258 = vmatprep.subr.bf16.mxu0 %v2902_v0 }
  0xde   :  { %2259 = vmatpush3.bf16.msra.mxu0 %v3087_v9 }
  0xdf   :  { %2260 = vmatprep.subr.bf16.mxu0 %v2902_v0 }
  0xe2   :  { %2261 = vmatpush3.bf16.msra.mxu0 %v3094_v10 }
  0xe3   :  { %2262 = vmatprep.subr.bf16.mxu0 %v2902_v0 }
  0xe6   :  { %2263 = vmatpush3.bf16.msra.mxu0 %v3101_v11 }
  0xe7   :  { %2264 = vmatprep.subr.bf16.mxu0 %v2902_v0 }
  0xea   :  { %2265 = vmatpush3.bf16.msra.mxu0 %v3110_v12 }
  0xeb   :  { %2296 = vmatprep.subr.bf16.mxu0 %v2902_v0 }
 0x115   :  { %v206_v18 = vpop.f32.mrf.mxu0 }
 0x116   :  { %v207_v19 = vadd.f32 %v3140_v17, %v206_v18  ;;  %v779_v18 = vpop.permute.xlu0 %778 }
 0x117   :  { %v2222_v20 = vpop.f32.mrf.mxu0 }
 0x118   :  { %v212_v21 = vmax.f32 %v207_v19, 0.0 }
 0x119   :  { %v209_v22 = vpop.f32.mrf.mxu0 }
 0x11a   :  { %v213_v23 = vpack.c.bf16 %v212_v21, %v212_v21 }
 0x11b   :  { %v2223_v24 = vpop.f32.mrf.mxu0 }
 0x11c   :  { %2241 = vmatmul.mubr.bf16.vlgmr.msra.gmra.mxu1 %v213_v23  ;;  %v2910_v23 = vmov 0  }
 0x11d   :  { %2271 = vmatpush3.bf16.msra.mxu1 %v3040_v1  ;;  %2272 = vmatprep.mubr.msk.bf16.mxu1 %vm2903_vm0, %v2902_v0 }
 0x11e   :  { %2276 = vmatprep.subr.bf16.mxu1 %v2902_v0  ;;  %2689 = vset.pattern.permute.xlu1 %v2910_v23 }
 0x11f   :  { %2690 = vset.pattern.permute.xlu0 %v2910_v23 }
 0x124   :  { %2273 = vmatmul.mubr.msk.bf16.vlgmr.msra.gmra.mxu1 %vm168_vm1, %v407_v15 }
 0x125   :  { %2277 = vmatpush3.bf16.msra.mxu1 %v3055_v5  ;;  %2292 = vmatprep.mubr.msk.bf16.mxu1 %vm2903_vm0, %v2902_v0 }
 0x126   :  { %2278 = vmatprep.subr.bf16.mxu1 %v2902_v0 }
 0x129   :  { %2279 = vmatpush3.bf16.msra.mxu1 %v3063_v6 }
 0x12a   :  { %2280 = vmatprep.subr.bf16.mxu1 %v2902_v0 }
 0x12d   :  { %2281 = vmatpush3.bf16.msra.mxu1 %v3074_v7 }
 0x12e   :  { %2282 = vmatprep.subr.bf16.mxu1 %v2902_v0 }
 0x131   :  { %2283 = vmatpush3.bf16.msra.mxu1 %v3080_v8 }
 0x132   :  { %2284 = vmatprep.subr.bf16.mxu1 %v2902_v0 }
 0x135   :  { %2285 = vmatpush3.bf16.msra.mxu1 %v3087_v9 }
 0x136   :  { %2286 = vmatprep.subr.bf16.mxu1 %v2902_v0 }
 0x139   :  { %2287 = vmatpush3.bf16.msra.mxu1 %v3094_v10 }
 0x13a   :  { %2288 = vmatprep.subr.bf16.mxu1 %v2902_v0 }
 0x13d   :  { %2289 = vmatpush3.bf16.msra.mxu1 %v3101_v11 }
 0x13e   :  { %2290 = vmatprep.subr.bf16.mxu1 %v2902_v0 }
 0x141   :  { %2291 = vmatpush3.bf16.msra.mxu1 %v3110_v12 }
 0x142   :  { %2322 = vmatprep.subr.bf16.mxu1 %v2902_v0 }
 0x18d   :  { %v352_v27 = vpop.f32.mrf.mxu0 }
 0x18e   :  { %v353_v28 = vadd.f32 %v3140_v17, %v352_v27 }
 0x18f   :  { %v2248_v29 = vpop.f32.mrf.mxu0 }
 0x190   :  { %v358_v30 = vmax.f32 %v353_v28, 0.0  ;;  %v1069_v29 = vsel %vm1068_vm2, 1, %v2910_v23  ;;  %vm1938_vm2 = vcmask 23552  }
 0x191   :  { %v355_v31 = vpop.f32.mrf.mxu0  ;;  %1071 = vperm.xlu1 %2689, %v1069_v29  }
 0x192   :  { %v359_v32 = vpack.c.bf16 %v358_v30, %v358_v30 }
 0x193   :  { %v2249_v33 = vpop.f32.mrf.mxu0 }
 0x194   :  { %2267 = vmatmul.mubr.bf16.vlgmr.msra.gmra.mxu0 %v359_v32  ;;  %v872_v33 = vpop.permute.xlu0 %871 }
 0x195   :  { %2297 = vmatpush3.bf16.msra.mxu0 %v3040_v1  ;;  %2298 = vmatprep.mubr.msk.bf16.mxu0 %vm2903_vm0, %v2902_v0 }
 0x196   :  { %2302 = vmatprep.subr.bf16.mxu0 %v2902_v0 }
 0x19c   :  { %2299 = vmatmul.mubr.msk.bf16.vlgmr.msra.gmra.mxu0 %vm168_vm1, %v500_v35 }
 0x19d   :  { %2303 = vmatpush3.bf16.msra.mxu0 %v3055_v5  ;;  %2318 = vmatprep.mubr.msk.bf16.mxu0 %vm2903_vm0, %v2902_v0 }
 0x19e   :  { %2304 = vmatprep.subr.bf16.mxu0 %v2902_v0 }
 0x1a1   :  { %2305 = vmatpush3.bf16.msra.mxu0 %v3063_v6 }
 0x1a2   :  { %2306 = vmatprep.subr.bf16.mxu0 %v2902_v0 }
 0x1a5   :  { %2307 = vmatpush3.bf16.msra.mxu0 %v3074_v7 }
 0x1a6   :  { %2308 = vmatprep.subr.bf16.mxu0 %v2902_v0 }
 0x1a9   :  { %2309 = vmatpush3.bf16.msra.mxu0 %v3080_v8 }
 0x1aa   :  { %2310 = vmatprep.subr.bf16.mxu0 %v2902_v0 }
 0x1ad   :  { %2311 = vmatpush3.bf16.msra.mxu0 %v3087_v9 }
 0x1ae   :  { %2312 = vmatprep.subr.bf16.mxu0 %v2902_v0 }
 0x1b1   :  { %2313 = vmatpush3.bf16.msra.mxu0 %v3094_v10 }
 0x1b2   :  { %2314 = vmatprep.subr.bf16.mxu0 %v2902_v0 }
 0x1b5   :  { %2315 = vmatpush3.bf16.msra.mxu0 %v3101_v11 }
 0x1b6   :  { %2316 = vmatprep.subr.bf16.mxu0 %v2902_v0 }
 0x1b9   :  { %2317 = vmatpush3.bf16.msra.mxu0 %v3110_v12 }
 0x1ba   :  { %2348 = vmatprep.subr.bf16.mxu0 %v2902_v0 }
 0x1dc   :  { %v3196_v36 = vpop.f32.mrf.mxu1 }
 0x1de   :  { %v2242_v37 = vpop.f32.mrf.mxu1 }
 0x1df   :  { %v3315_v37 = vld [vmem:[#allocation7 + $0x38] sm:$0xff]  }
 0x1e0   :  { %v305_v38 = vpop.f32.mrf.mxu1 }
 0x1e2   :  { %v2243_v39 = vpop.f32.mrf.mxu1 }
 0x1e3   :  { %v3324_v39 = vld [vmem:[#allocation7 + $0x28] sm:$0xff]  }
 0x1e4   :  { %v445_v40 = vpop.f32.mrf.mxu1 }
 0x1e5   :  { %v446_v41 = vadd.f32 %v3140_v17, %v445_v40  ;;  %v3328_v40 = vld [vmem:[#allocation7 + $0x20] sm:$0xff]  }
 0x1e6   :  { %v2274_v42 = vpop.f32.mrf.mxu1 }
 0x1e7   :  { %v451_v43 = vmax.f32 %v446_v41, 0.0  ;;  %v3332_v41 = vld [vmem:[#allocation7 + $0x18] sm:$0xff]   ;;  %v3336_v42 = vld [vmem:[#allocation7 + $0x10] sm:$0xff]  }
 0x1e8   :  { %v448_v44 = vpop.f32.mrf.mxu1 }
 0x1e9   :  { %v452_v45 = vpack.c.bf16 %v451_v43, %v451_v43  ;;  %v3340_v43 = vld [vmem:[#allocation7 + $0x8] sm:$0xff]   ;;  %v3344_v44 = vld [vmem:[#allocation7] sm:$0xff]  }
 0x1ea   :  { %v2275_v46 = vpop.f32.mrf.mxu1 }
 0x1eb   :  { %2293 = vmatmul.mubr.bf16.vlgmr.msra.gmra.mxu1 %v452_v45 }
 0x1ec   :  { %2323 = vmatpush3.bf16.msra.mxu1 %v3040_v1  ;;  %2324 = vmatprep.mubr.msk.bf16.mxu1 %vm2903_vm0, %v2902_v0 }
 0x1ed   :  { %2328 = vmatprep.subr.bf16.mxu1 %v2902_v0 }
 0x1f3   :  { %2325 = vmatmul.mubr.msk.bf16.vlgmr.msra.gmra.mxu1 %vm168_vm1, %v593_v34 }
 0x1f4   :  { %2329 = vmatpush3.bf16.msra.mxu1 %v3055_v5  ;;  %2344 = vmatprep.mubr.msk.bf16.mxu1 %vm2903_vm0, %v2902_v0 }
 0x1f5   :  { %2330 = vmatprep.subr.bf16.mxu1 %v2902_v0 }
 0x1f8   :  { %2331 = vmatpush3.bf16.msra.mxu1 %v3063_v6 }
 0x1f9   :  { %2332 = vmatprep.subr.bf16.mxu1 %v2902_v0 }
 0x1fc   :  { %2333 = vmatpush3.bf16.msra.mxu1 %v3074_v7 }
 0x1fd   :  { %2334 = vmatprep.subr.bf16.mxu1 %v2902_v0 }
 0x200   :  { %2335 = vmatpush3.bf16.msra.mxu1 %v3080_v8 }
 0x201   :  { %2336 = vmatprep.subr.bf16.mxu1 %v2902_v0 }
 0x204   :  { %2337 = vmatpush3.bf16.msra.mxu1 %v3087_v9 }
 0x205   :  { %2338 = vmatprep.subr.bf16.mxu1 %v2902_v0 }
 0x208   :  { %2339 = vmatpush3.bf16.msra.mxu1 %v3094_v10 }
 0x209   :  { %2340 = vmatprep.subr.bf16.mxu1 %v2902_v0 }
 0x20c   :  { %2341 = vmatpush3.bf16.msra.mxu1 %v3101_v11 }
 0x20d   :  { %2342 = vmatprep.subr.bf16.mxu1 %v2902_v0 }
 0x210   :  { %2343 = vmatpush3.bf16.msra.mxu1 %v3110_v12 }
 0x211   :  { %2374 = vmatprep.subr.bf16.mxu1 %v2902_v0 }
 0x254   :  { %v3225_v48 = vpop.f32.mrf.mxu0 }
 0x256   :  { %v2268_v49 = vpop.f32.mrf.mxu0 }
 0x258   :  { %v397_v50 = vpop.f32.mrf.mxu0 }
 0x25a   :  { %v2269_v51 = vpop.f32.mrf.mxu0 }
 0x25c   :  { %v538_v52 = vpop.f32.mrf.mxu0 }
 0x25d   :  { %v539_v53 = vadd.f32 %v3140_v17, %v538_v52 }
 0x25e   :  { %v2300_v54 = vpop.f32.mrf.mxu0 }
 0x25f   :  { %v544_v55 = vmax.f32 %v539_v53, 0.0 }
 0x260   :  { %v541_v56 = vpop.f32.mrf.mxu0 }
 0x261   :  { %v545_v57 = vpack.c.bf16 %v544_v55, %v544_v55 }
 0x262   :  { %v2301_v58 = vpop.f32.mrf.mxu0 }
 0x263   :  { %2319 = vmatmul.mubr.bf16.vlgmr.msra.gmra.mxu0 %v545_v57  ;;  %v1120_v57 = vsel %vm1119_vm3, 1, %v2910_v23 }
 0x264   :  { %2349 = vmatpush3.bf16.msra.mxu0 %v3040_v1  ;;  %2350 = vmatprep.mubr.msk.bf16.mxu0 %vm2903_vm0, %v2902_v0 }
 0x265   :  { %2354 = vmatprep.subr.bf16.mxu0 %v2902_v0  ;;  %1122 = vperm.xlu0 %2690, %v1120_v57  }
 0x26b   :  { %2351 = vmatmul.mubr.msk.bf16.vlgmr.msra.gmra.mxu0 %vm168_vm1, %v686_v59 }
 0x26c   :  { %2355 = vmatpush3.bf16.msra.mxu0 %v3055_v5  ;;  %2370 = vmatprep.mubr.msk.bf16.mxu0 %vm2903_vm0, %v2902_v0 }
 0x26d   :  { %2356 = vmatprep.subr.bf16.mxu0 %v2902_v0 }
 0x270   :  { %2357 = vmatpush3.bf16.msra.mxu0 %v3063_v6 }
 0x271   :  { %2358 = vmatprep.subr.bf16.mxu0 %v2902_v0 }
 0x274   :  { %2359 = vmatpush3.bf16.msra.mxu0 %v3074_v7 }
 0x275   :  { %2360 = vmatprep.subr.bf16.mxu0 %v2902_v0 }
 0x278   :  { %2361 = vmatpush3.bf16.msra.mxu0 %v3080_v8 }
 0x279   :  { %2362 = vmatprep.subr.bf16.mxu0 %v2902_v0 }
 0x27c   :  { %2363 = vmatpush3.bf16.msra.mxu0 %v3087_v9 }
 0x27d   :  { %2364 = vmatprep.subr.bf16.mxu0 %v2902_v0 }
 0x280   :  { %2365 = vmatpush3.bf16.msra.mxu0 %v3094_v10 }
 0x281   :  { %2366 = vmatprep.subr.bf16.mxu0 %v2902_v0 }
 0x284   :  { %2367 = vmatpush3.bf16.msra.mxu0 %v3101_v11 }
 0x285   :  { %2368 = vmatprep.subr.bf16.mxu0 %v2902_v0 }
 0x288   :  { %2369 = vmatpush3.bf16.msra.mxu0 %v3110_v12 }
 0x289   :  { %2400 = vmatprep.subr.bf16.mxu0 %v2902_v0 }
 0x2ab   :  { %v3251_v60 = vpop.f32.mrf.mxu1 }
 0x2ad   :  { %v2294_v61 = vpop.f32.mrf.mxu1 }
 0x2af   :  { %v490_v62 = vpop.f32.mrf.mxu1 }
 0x2b0   :  { %v3396_v62 = vld [vmem:[%s3612_s7] ss:$0 sm:$0xff] }
 0x2b1   :  { %v2295_v63 = vpop.f32.mrf.mxu1 }
 0x2b2   :  { %v303_v63 = vadd.f32 %v3396_v62, %v3196_v36 }
 0x2b3   :  { %v631_v2 = vpop.f32.mrf.mxu1 }
 0x2b4   :  { %v632_v3 = vadd.f32 %v3140_v17, %v631_v2 }
 0x2b5   :  { %v2326_v4 = vpop.f32.mrf.mxu1 }
 0x2b6   :  { %v637_v13 = vmax.f32 %v632_v3, 0.0 }
 0x2b7   :  { %v634_v14 = vpop.f32.mrf.mxu1 }
 0x2b8   :  { %v638_v15 = vpack.c.bf16 %v637_v13, %v637_v13 }
 0x2b9   :  { %v2327_v16 = vpop.f32.mrf.mxu1 }
 0x2ba   :  { %2345 = vmatmul.mubr.bf16.vlgmr.msra.gmra.mxu1 %v638_v15 }
 0x2bb   :  { %2375 = vmatpush3.bf16.msra.mxu1 %v3040_v1  ;;  %2376 = vmatprep.mubr.msk.bf16.mxu1 %vm2903_vm0, %v2902_v0 }
 0x2bc   :  { %2380 = vmatprep.subr.bf16.mxu1 %v2902_v0 }
 0x2c2   :  { %2377 = vmatmul.mubr.msk.bf16.vlgmr.msra.gmra.mxu1 %vm168_vm1, %v779_v18 }
 0x2c3   :  { %2381 = vmatpush3.bf16.msra.mxu1 %v3055_v5  ;;  %2396 = vmatprep.mubr.msk.bf16.mxu1 %vm2903_vm0, %v2902_v0 }
 0x2c4   :  { %2382 = vmatprep.subr.bf16.mxu1 %v2902_v0 }
 0x2c7   :  { %2383 = vmatpush3.bf16.msra.mxu1 %v3063_v6 }
 0x2c8   :  { %2384 = vmatprep.subr.bf16.mxu1 %v2902_v0 }
 0x2cb   :  { %2385 = vmatpush3.bf16.msra.mxu1 %v3074_v7 }
 0x2cc   :  { %2386 = vmatprep.subr.bf16.mxu1 %v2902_v0 }
 0x2cf   :  { %2387 = vmatpush3.bf16.msra.mxu1 %v3080_v8 }
 0x2d0   :  { %2388 = vmatprep.subr.bf16.mxu1 %v2902_v0 }
 0x2d3   :  { %2389 = vmatpush3.bf16.msra.mxu1 %v3087_v9 }
 0x2d4   :  { %2390 = vmatprep.subr.bf16.mxu1 %v2902_v0 }
 0x2d7   :  { %2391 = vmatpush3.bf16.msra.mxu1 %v3094_v10 }
 0x2d8   :  { %2392 = vmatprep.subr.bf16.mxu1 %v2902_v0 }
 0x2db   :  { %2393 = vmatpush3.bf16.msra.mxu1 %v3101_v11 }
 0x2dc   :  { %2394 = vmatprep.subr.bf16.mxu1 %v2902_v0 }
 0x2df   :  { %2395 = vmatpush3.bf16.msra.mxu1 %v3110_v12 }
 0x2e0   :  { %2426 = vmatprep.subr.bf16.mxu1 %v2902_v0 }
 0x323   :  { %v3277_v19 = vpop.f32.mrf.mxu0 }
 0x325   :  { %v2320_v20 = vpop.f32.mrf.mxu0 }
 0x327   :  { %v583_v21 = vpop.f32.mrf.mxu0 }
 0x329   :  { %v2321_v22 = vpop.f32.mrf.mxu0 }
 0x32a   :  { %v1171_v22 = vsel %vm1170_vm4, 1, %v2910_v23 }
 0x32b   :  { %v724_v24 = vpop.f32.mrf.mxu0  ;;  %1173 = vperm.xlu1 %2689, %v1171_v22  }
 0x32c   :  { %v725_v25 = vadd.f32 %v3140_v17, %v724_v24  ;;  %v395_v24 = vadd.f32 %v3396_v62, %v3225_v48  ;;  %v1222_v48 = vsel %vm1221_vm7, 1, %v2910_v23 }
 0x32d   :  { %v2352_v27 = vpop.f32.mrf.mxu0 }
 0x32e   :  { %v730_v28 = vmax.f32 %v725_v25, 0.0 }
 0x32f   :  { %v727_v30 = vpop.f32.mrf.mxu0  ;;  %1224 = vperm.xlu1 %2689, %v1222_v48  }
 0x330   :  { %v731_v31 = vpack.c.bf16 %v730_v28, %v730_v28 }
 0x331   :  { %v2353_v32 = vpop.f32.mrf.mxu0 }
 0x332   :  { %2371 = vmatmul.mubr.bf16.vlgmr.msra.gmra.mxu0 %v731_v31  ;;  %v1072_v31 = vpop.permute.xlu1 %1071  ;;  %v1123_v32 = vpop.permute.xlu0 %1122 }
 0x333   :  { %2401 = vmatpush3.bf16.msra.mxu0 %v3040_v1  ;;  %2402 = vmatprep.mubr.msk.bf16.mxu0 %vm2903_vm0, %v2902_v0  ;;  %vm1073_vm5 = vcmp.eq.s32.totalorder %v1072_v31, 1  ;;  %vm1124_vm6 = vcmp.eq.s32.totalorder %v1123_v32, 1  ;;  %v2722_v31 = vld [vmem:[#allocation8 + $0x8] sm:$0xff]   ;;  %v2723_v32 = vld [vmem:[#allocation8] sm:$0xff]  }
 0x334   :  { %2406 = vmatprep.subr.bf16.mxu0 %v2902_v0 }
 0x33a   :  { %2403 = vmatmul.mubr.msk.bf16.vlgmr.msra.gmra.mxu0 %vm168_vm1, %v872_v33 }
 0x33b   :  { %2407 = vmatpush3.bf16.msra.mxu0 %v3055_v5  ;;  %2422 = vmatprep.mubr.msk.bf16.mxu0 %vm2903_vm0, %v2902_v0 }
 0x33c   :  { %2408 = vmatprep.subr.bf16.mxu0 %v2902_v0 }
 0x33f   :  { %2409 = vmatpush3.bf16.msra.mxu0 %v3063_v6 }
 0x340   :  { %2410 = vmatprep.subr.bf16.mxu0 %v2902_v0 }
 0x343   :  { %2411 = vmatpush3.bf16.msra.mxu0 %v3074_v7 }
 0x344   :  { %2412 = vmatprep.subr.bf16.mxu0 %v2902_v0 }
 0x347   :  { %2413 = vmatpush3.bf16.msra.mxu0 %v3080_v8 }
 0x348   :  { %2414 = vmatprep.subr.bf16.mxu0 %v2902_v0 }
 0x34b   :  { %2415 = vmatpush3.bf16.msra.mxu0 %v3087_v9 }
 0x34c   :  { %2416 = vmatprep.subr.bf16.mxu0 %v2902_v0 }
 0x34f   :  { %2417 = vmatpush3.bf16.msra.mxu0 %v3094_v10 }
 0x350   :  { %2418 = vmatprep.subr.bf16.mxu0 %v2902_v0 }
 0x353   :  { %2419 = vmatpush3.bf16.msra.mxu0 %v3101_v11 }
 0x354   :  { %2420 = vmatprep.subr.bf16.mxu0 %v2902_v0 }
 0x357   :  { %2421 = vmatpush3.bf16.msra.mxu0 %v3110_v12  ;;  %v3318_v12 = vld [vmem:[#allocation7 + $0x30] sm:$0xff]  }
 0x358   :  { %2446 = vmatprep.subr.bf16.mxu0 %v2902_v0 }
 0x37a   :  { %v3312_v1 = vpop.f32.mrf.mxu1 }
 0x37c   :  { %v2346_v5 = vpop.f32.mrf.mxu1 }
 0x37e   :  { %v676_v6 = vpop.f32.mrf.mxu1 }
 0x380   :  { %v2347_v7 = vpop.f32.mrf.mxu1 }
 0x382   :  { %v817_v8 = vpop.f32.mrf.mxu1 }
 0x383   :  { %v818_v9 = vadd.f32 %v3140_v17, %v817_v8  ;;  %v488_v8 = vadd.f32 %v3396_v62, %v3251_v60  ;;  %v1273_v60 = vsel %vm1272_vm9, 1, %v2910_v23 }
 0x384   :  { %v2378_v34 = vpop.f32.mrf.mxu1  ;;  %1275 = vperm.xlu0 %2690, %v1273_v60   ;;  %v2724_v60 = vld [vmem:[#allocation11 + $0x38] sm:$0xff]  }
 0x385   :  { %v823_v10 = vmax.f32 %v818_v9, 0.0 }
 0x386   :  { %v820_v35 = vpop.f32.mrf.mxu1 }
 0x387   :  { %v824_v11 = vpack.c.bf16 %v823_v10, %v823_v10 }
 0x388   :  { %v2379_v38 = vpop.f32.mrf.mxu1 }
 0x389   :  { %2397 = vmatmul.mubr.bf16.vlgmr.msra.gmra.mxu1 %v824_v11 }
 0x38a   :  { %2427 = vmatpush3.bf16.msra.mxu1 %v3315_v37  ;;  %2442 = vmatprep.mubr.msk.bf16.mxu1 %vm2903_vm0, %v2902_v0 }
 0x38b   :  { %2428 = vmatprep.subr.bf16.mxu1 %v2902_v0 }
 0x38e   :  { %2429 = vmatpush3.bf16.msra.mxu1 %v3318_v12 }
 0x38f   :  { %2430 = vmatprep.subr.bf16.mxu1 %v2902_v0 }
 0x392   :  { %2431 = vmatpush3.bf16.msra.mxu1 %v3324_v39 }
 0x393   :  { %2432 = vmatprep.subr.bf16.mxu1 %v2902_v0 }
 0x396   :  { %2433 = vmatpush3.bf16.msra.mxu1 %v3328_v40 }
 0x397   :  { %2434 = vmatprep.subr.bf16.mxu1 %v2902_v0 }
 0x39a   :  { %2435 = vmatpush3.bf16.msra.mxu1 %v3332_v41 }
 0x39b   :  { %2436 = vmatprep.subr.bf16.mxu1 %v2902_v0 }
 0x39e   :  { %2437 = vmatpush3.bf16.msra.mxu1 %v3336_v42 }
 0x39f   :  { %2438 = vmatprep.subr.bf16.mxu1 %v2902_v0 }
 0x3a2   :  { %2439 = vmatpush3.bf16.msra.mxu1 %v3340_v43 }
 0x3a3   :  { %2440 = vmatprep.subr.bf16.mxu1 %v2902_v0 }
 0x3a6   :  { %2441 = vmatpush3.bf16.msra.mxu1 %v3344_v44  ;;  %v1174_v38 = vpop.permute.xlu1 %1173 }
 0x3a7   :  { %2466 = vmatprep.subr.bf16.mxu1 %v2902_v0  ;;  %vm1175_vm8 = vcmp.eq.s32.totalorder %v1174_v38, 1 }
 0x3a9   :  { %2443 = vmatmul.mubr.bf16.vlgmr.msra.gmra.mxu1 %v2910_v23 }
 0x3aa   :  { %2467 = vmatpush3.bf16.msra.mxu1 %v3315_v37  ;;  %2482 = vmatprep.mubr.msk.bf16.mxu1 %vm2903_vm0, %v2902_v0 }
 0x3ab   :  { %2468 = vmatprep.subr.bf16.mxu1 %v2902_v0 }
 0x3ae   :  { %2469 = vmatpush3.bf16.msra.mxu1 %v3318_v12 }
 0x3af   :  { %2470 = vmatprep.subr.bf16.mxu1 %v2902_v0 }
 0x3b2   :  { %2471 = vmatpush3.bf16.msra.mxu1 %v3324_v39 }
 0x3b3   :  { %2472 = vmatprep.subr.bf16.mxu1 %v2902_v0 }
 0x3b6   :  { %2473 = vmatpush3.bf16.msra.mxu1 %v3328_v40 }
 0x3b7   :  { %2474 = vmatprep.subr.bf16.mxu1 %v2902_v0 }
 0x3ba   :  { %2475 = vmatpush3.bf16.msra.mxu1 %v3332_v41 }
 0x3bb   :  { %2476 = vmatprep.subr.bf16.mxu1 %v2902_v0 }
 0x3be   :  { %2477 = vmatpush3.bf16.msra.mxu1 %v3336_v42 }
 0x3bf   :  { %2478 = vmatprep.subr.bf16.mxu1 %v2902_v0 }
 0x3c2   :  { %2479 = vmatpush3.bf16.msra.mxu1 %v3340_v43 }
 0x3c3   :  { %2480 = vmatprep.subr.bf16.mxu1 %v2902_v0 }
 0x3c6   :  { %2481 = vmatpush3.bf16.msra.mxu1 %v3344_v44 }
 0x3c7   :  { %2506 = vmatprep.subr.bf16.mxu1 %v2902_v0 }
 0x3f2   :  { %v3368_v45 = vpop.f32.mrf.mxu0 }
 0x3f4   :  { %v2372_v46 = vpop.f32.mrf.mxu0 }
 0x3f6   :  { %v769_v47 = vpop.f32.mrf.mxu0 }
 0x3f8   :  { %v2373_v49 = vpop.f32.mrf.mxu0 }
 0x3fa   :  { %v910_v50 = vpop.f32.mrf.mxu0 }
 0x3fb   :  { %v911_v51 = vadd.f32 %v3140_v17, %v910_v50  ;;  %v581_v50 = vadd.f32 %v3396_v62, %v3277_v19  ;;  %v1324_v19 = vsel %vm1323_vm11, 1, %v2910_v23 }
 0x3fc   :  { %v2404_v52 = vpop.f32.mrf.mxu0  ;;  %1326 = vperm.xlu1 %2689, %v1324_v19   ;;  %v2734_v19 = vld [vmem:[#allocation10 + $0x18] sm:$0xff]  }
 0x3fd   :  { %v916_v53 = vmax.f32 %v911_v51, 0.0 }
 0x3fe   :  { %v913_v54 = vpop.f32.mrf.mxu0 }
 0x3ff   :  { %v917_v55 = vpack.c.bf16 %v916_v53, %v916_v53 }
 0x400   :  { %v2405_v56 = vpop.f32.mrf.mxu0 }
 0x401   :  { %2423 = vmatmul.mubr.bf16.vlgmr.msra.gmra.mxu0 %v917_v55  ;;  %v1225_v56 = vpop.permute.xlu1 %1224 }
 0x402   :  { %2447 = vmatpush3.bf16.msra.mxu0 %v3315_v37  ;;  %2462 = vmatprep.mubr.msk.bf16.mxu0 %vm2903_vm0, %v2902_v0  ;;  %vm1226_vm10 = vcmp.eq.s32.totalorder %v1225_v56, 1  ;;  %v2729_v56 = vld [vmem:[#allocation11 + $0x20] sm:$0xff]  }
 0x403   :  { %2448 = vmatprep.subr.bf16.mxu0 %v2902_v0 }
 0x406   :  { %2449 = vmatpush3.bf16.msra.mxu0 %v3318_v12 }
 0x407   :  { %2450 = vmatprep.subr.bf16.mxu0 %v2902_v0 }
 0x40a   :  { %2451 = vmatpush3.bf16.msra.mxu0 %v3324_v39 }
 0x40b   :  { %2452 = vmatprep.subr.bf16.mxu0 %v2902_v0 }
 0x40e   :  { %2453 = vmatpush3.bf16.msra.mxu0 %v3328_v40 }
 0x40f   :  { %2454 = vmatprep.subr.bf16.mxu0 %v2902_v0 }
 0x412   :  { %2455 = vmatpush3.bf16.msra.mxu0 %v3332_v41 }
 0x413   :  { %2456 = vmatprep.subr.bf16.mxu0 %v2902_v0 }
 0x416   :  { %2457 = vmatpush3.bf16.msra.mxu0 %v3336_v42 }
 0x417   :  { %2458 = vmatprep.subr.bf16.mxu0 %v2902_v0 }
 0x41a   :  { %2459 = vmatpush3.bf16.msra.mxu0 %v3340_v43 }
 0x41b   :  { %2460 = vmatprep.subr.bf16.mxu0 %v2902_v0 }
 0x41e   :  { %2461 = vmatpush3.bf16.msra.mxu0 %v3344_v44 }
 0x41f   :  { %2486 = vmatprep.subr.bf16.mxu0 %v2902_v0 }
 0x449   :  { %v3391_v17 = vpop.f32.mrf.mxu1 }
 0x44b   :  { %v2398_v58 = vpop.f32.mrf.mxu1 }
 0x44d   :  { %v862_v59 = vpop.f32.mrf.mxu1 }
 0x44f   :  { %v2399_v61 = vpop.f32.mrf.mxu1 }
 0x450   :  { %v674_v61 = vadd.f32 %v3396_v62, %v3312_v1  ;;  %v1375_v1 = vsel %vm1374_vm13, 1, %v2910_v23 }
 0x451   :  { %1377 = vperm.xlu0 %2690, %v1375_v1  }
 0x469   :  { %v1060_v2 = vpop.f32.mrf.mxu1 }
 0x46a   :  { %v1066_v3 = vadd.f32 %v1060_v2, %v303_v63 }
 0x46b   :  { %v2444_v4 = vpop.f32.mrf.mxu1 }
 0x46c   :  { %2748 = vtanh.f32 %v1066_v3 }
 0x46d   :  { %v1063_v13 = vpop.f32.mrf.mxu1 }
 0x46f   :  { %v2445_v14 = vpop.f32.mrf.mxu1 }
 0x470   :  { %v1276_v14 = vpop.permute.xlu0 %1275 }
 0x471   :  { %vm1277_vm12 = vcmp.eq.s32.totalorder %v1276_v14, 1 }
 0x479   :  { %v2749_v15 = vpop.eup %2748 }
 0x47a   :  { %v1075_v16 = vpack.c.bf16 %v2749_v15, %v2749_v15  ;;  %v1074_v5 = vsel %vm1073_vm5, %v2749_v15, 0.0 }
 0x47c   :  { %2463 = vmatmul.mubr.bf16.vlgmr.msra.gmra.mxu0 %v1075_v16 }
 0x47d   :  { %2487 = vmatpush3.bf16.msra.mxu0 %v3315_v37  ;;  %2502 = vmatprep.mubr.msk.bf16.mxu0 %vm2903_vm0, %v2902_v0 }
 0x47e   :  { %2488 = vmatprep.subr.bf16.mxu0 %v2902_v0 }
 0x481   :  { %2489 = vmatpush3.bf16.msra.mxu0 %v3318_v12 }
 0x482   :  { %2490 = vmatprep.subr.bf16.mxu0 %v2902_v0 }
 0x485   :  { %2491 = vmatpush3.bf16.msra.mxu0 %v3324_v39 }
 0x486   :  { %2492 = vmatprep.subr.bf16.mxu0 %v2902_v0 }
 0x489   :  { %2493 = vmatpush3.bf16.msra.mxu0 %v3328_v40 }
 0x48a   :  { %2494 = vmatprep.subr.bf16.mxu0 %v2902_v0 }
 0x48d   :  { %2495 = vmatpush3.bf16.msra.mxu0 %v3332_v41 }
 0x48e   :  { %2496 = vmatprep.subr.bf16.mxu0 %v2902_v0 }
 0x491   :  { %2497 = vmatpush3.bf16.msra.mxu0 %v3336_v42 }
 0x492   :  { %2498 = vmatprep.subr.bf16.mxu0 %v2902_v0 }
 0x495   :  { %2499 = vmatpush3.bf16.msra.mxu0 %v3340_v43 }
 0x496   :  { %2500 = vmatprep.subr.bf16.mxu0 %v2902_v0 }
 0x499   :  { %2501 = vmatpush3.bf16.msra.mxu0 %v3344_v44 }
 0x49a   :  { %2526 = vmatprep.subr.bf16.mxu0 %v2902_v0 }
 0x4c1   :  { %v3418_v36 = vpop.f32.mrf.mxu0 }
 0x4c3   :  { %v2424_v18 = vpop.f32.mrf.mxu0 }
 0x4c5   :  { %v955_v20 = vpop.f32.mrf.mxu0 }
 0x4c7   :  { %v2425_v21 = vpop.f32.mrf.mxu0 }
 0x53c   :  { %v1111_v25 = vpop.f32.mrf.mxu0 }
 0x53d   :  { %v1117_v27 = vadd.f32 %v1111_v25, %v395_v24  ;;  %v2716_v24 = vld [vmem:[#allocation8 + $0x38] sm:$0xff]   ;;  %v2717_v25 = vld [vmem:[#allocation8 + $0x30] sm:$0xff]  }
 0x53e   :  { %v2464_v28 = vpop.f32.mrf.mxu0 }
 0x53f   :  { %2750 = vtanh.f32 %v1117_v27  ;;  %v2718_v27 = vld [vmem:[#allocation8 + $0x28] sm:$0xff]   ;;  %v2719_v28 = vld [vmem:[#allocation8 + $0x20] sm:$0xff]  }
 0x540   :  { %v1114_v29 = vpop.f32.mrf.mxu0 }
 0x541   :  { %v2720_v29 = vld [vmem:[#allocation8 + $0x18] sm:$0xff]  }
 0x542   :  { %v2465_v30 = vpop.f32.mrf.mxu0 }
 0x543   :  { %v2721_v30 = vld [vmem:[#allocation8 + $0x10] sm:$0xff]  }
 0x54c   :  { %v2751_v33 = vpop.eup %2750 }
 0x54d   :  { %v1125_v6 = vsel %vm1124_vm6, %v2751_v33, %v1074_v5  ;;  %v1126_v7 = vpack.c.bf16 %v2751_v33, %v2751_v33  ;;  %v1426_v33 = vsel %vm1425_vm15, 1, %v2910_v23  ;;  %v860_v5 = vadd.f32 %v3396_v62, %v3391_v17 }
 0x54e   :  { %1428 = vperm.xlu1 %2689, %v1426_v33  }
 0x54f   :  { %2483 = vmatmul.mubr.bf16.vlgmr.msra.gmra.mxu1 %v1126_v7 }
 0x550   :  { %2507 = vmatpush3.bf16.msra.mxu1 %v3315_v37  ;;  %2522 = vmatprep.mubr.msk.bf16.mxu1 %vm2903_vm0, %v2902_v0 }
 0x551   :  { %2508 = vmatprep.subr.bf16.mxu1 %v2902_v0 }
 0x554   :  { %2509 = vmatpush3.bf16.msra.mxu1 %v3318_v12 }
 0x555   :  { %2510 = vmatprep.subr.bf16.mxu1 %v2902_v0 }
 0x558   :  { %2511 = vmatpush3.bf16.msra.mxu1 %v3324_v39 }
 0x559   :  { %2512 = vmatprep.subr.bf16.mxu1 %v2902_v0 }
 0x55c   :  { %2513 = vmatpush3.bf16.msra.mxu1 %v3328_v40 }
 0x55d   :  { %2514 = vmatprep.subr.bf16.mxu1 %v2902_v0 }
 0x560   :  { %2515 = vmatpush3.bf16.msra.mxu1 %v3332_v41 }
 0x561   :  { %2516 = vmatprep.subr.bf16.mxu1 %v2902_v0 }
 0x564   :  { %2517 = vmatpush3.bf16.msra.mxu1 %v3336_v42 }
 0x565   :  { %2518 = vmatprep.subr.bf16.mxu1 %v2902_v0 }
 0x568   :  { %2519 = vmatpush3.bf16.msra.mxu1 %v3340_v43 }
 0x569   :  { %2520 = vmatprep.subr.bf16.mxu1 %v2902_v0 }
 0x56c   :  { %2521 = vmatpush3.bf16.msra.mxu1 %v3344_v44 }
 0x56d   :  { %2546 = vmatprep.subr.bf16.mxu1 %v2902_v0 }
 0x60f   :  { %v1162_v9 = vpop.f32.mrf.mxu1 }
 0x610   :  { %v1168_v34 = vadd.f32 %v1162_v9, %v488_v8 }
 0x611   :  { %v2484_v10 = vpop.f32.mrf.mxu1 }
 0x612   :  { %2752 = vtanh.f32 %v1168_v34 }
 0x613   :  { %v1165_v35 = vpop.f32.mrf.mxu1 }
 0x614   :  { %v1378_v35 = vpop.permute.xlu0 %1377 }
 0x615   :  { %v2485_v11 = vpop.f32.mrf.mxu1 }
 0x61f   :  { %v2753_v46 = vpop.eup %2752 }
 0x620   :  { %v1176_v47 = vsel %vm1175_vm8, %v2753_v46, %v1125_v6  ;;  %v1177_v49 = vpack.c.bf16 %v2753_v46, %v2753_v46  ;;  %v2726_v46 = vld [vmem:[#allocation10 + $0x38] sm:$0xff]  }
 0x622   :  { %2503 = vmatmul.mubr.bf16.vlgmr.msra.gmra.mxu0 %v1177_v49 }
 0x623   :  { %2527 = vmatpush3.bf16.msra.mxu0 %v3315_v37  ;;  %2542 = vmatprep.mubr.msk.bf16.mxu0 %vm2903_vm0, %v2902_v0 }
 0x624   :  { %2528 = vmatprep.subr.bf16.mxu0 %v2902_v0 }
 0x627   :  { %2529 = vmatpush3.bf16.msra.mxu0 %v3318_v12 }
 0x628   :  { %2530 = vmatprep.subr.bf16.mxu0 %v2902_v0 }
 0x62b   :  { %2531 = vmatpush3.bf16.msra.mxu0 %v3324_v39 }
 0x62c   :  { %2532 = vmatprep.subr.bf16.mxu0 %v2902_v0 }
 0x62f   :  { %2533 = vmatpush3.bf16.msra.mxu0 %v3328_v40 }
 0x630   :  { %2534 = vmatprep.subr.bf16.mxu0 %v2902_v0 }
 0x633   :  { %2535 = vmatpush3.bf16.msra.mxu0 %v3332_v41 }
 0x634   :  { %2536 = vmatprep.subr.bf16.mxu0 %v2902_v0 }
 0x637   :  { %2537 = vmatpush3.bf16.msra.mxu0 %v3336_v42 }
 0x638   :  { %2538 = vmatprep.subr.bf16.mxu0 %v2902_v0 }
 0x63b   :  { %2539 = vmatpush3.bf16.msra.mxu0 %v3340_v43 }
 0x63c   :  { %2540 = vmatprep.subr.bf16.mxu0 %v2902_v0 }
 0x63f   :  { %2541 = vmatpush3.bf16.msra.mxu0 %v3344_v44 }
 0x640   :  { %2566 = vmatprep.subr.bf16.mxu0 %v2902_v0 }
 0x6e2   :  { %v1213_v51 = vpop.f32.mrf.mxu0 }
 0x6e3   :  { %v1219_v52 = vadd.f32 %v1213_v51, %v581_v50  ;;  %v2728_v50 = vld [vmem:[#allocation10 + $0x30] sm:$0xff]  }
 0x6e4   :  { %v2504_v53 = vpop.f32.mrf.mxu0 }
 0x6e5   :  { %2754 = vtanh.f32 %v1219_v52  ;;  %v2725_v53 = vld [vmem:[#allocation11 + $0x30] sm:$0xff]  }
 0x6e6   :  { %v1216_v54 = vpop.f32.mrf.mxu0 }
 0x6e7   :  { %v2730_v54 = vld [vmem:[#allocation10 + $0x28] sm:$0xff]  }
 0x6e8   :  { %v2505_v55 = vpop.f32.mrf.mxu0 }
 0x6e9   :  { %v2727_v55 = vld [vmem:[#allocation11 + $0x28] sm:$0xff]  }
 0x6f2   :  { %v2755_v57 = vpop.eup %2754 }
 0x6f3   :  { %v1227_v58 = vsel %vm1226_vm10, %v2755_v57, %v1176_v47  ;;  %v1228_v59 = vpack.c.bf16 %v2755_v57, %v2755_v57  ;;  %v2731_v57 = vld [vmem:[#allocation11 + $0x18] sm:$0xff]  }
 0x6f5   :  { %2523 = vmatmul.mubr.bf16.vlgmr.msra.gmra.mxu1 %v1228_v59  ;;  %v2733_v59 = vld [vmem:[#allocation11 + $0x10] sm:$0xff]  }
 0x6f6   :  { %2547 = vmatpush3.bf16.msra.mxu1 %v3315_v37  ;;  %2562 = vmatprep.mubr.msk.bf16.mxu1 %vm2903_vm0, %v2902_v0 }
 0x6f7   :  { %2548 = vmatprep.subr.bf16.mxu1 %v2902_v0 }
 0x6fa   :  { %2549 = vmatpush3.bf16.msra.mxu1 %v3318_v12 }
 0x6fb   :  { %2550 = vmatprep.subr.bf16.mxu1 %v2902_v0 }
 0x6fe   :  { %2551 = vmatpush3.bf16.msra.mxu1 %v3324_v39 }
 0x6ff   :  { %2552 = vmatprep.subr.bf16.mxu1 %v2902_v0 }
 0x702   :  { %2553 = vmatpush3.bf16.msra.mxu1 %v3328_v40 }
 0x703   :  { %2554 = vmatprep.subr.bf16.mxu1 %v2902_v0 }
 0x706   :  { %2555 = vmatpush3.bf16.msra.mxu1 %v3332_v41 }
 0x707   :  { %2556 = vmatprep.subr.bf16.mxu1 %v2902_v0 }
 0x70a   :  { %2557 = vmatpush3.bf16.msra.mxu1 %v3336_v42 }
 0x70b   :  { %2558 = vmatprep.subr.bf16.mxu1 %v2902_v0 }
 0x70e   :  { %2559 = vmatpush3.bf16.msra.mxu1 %v3340_v43 }
 0x70f   :  { %2560 = vmatprep.subr.bf16.mxu1 %v2902_v0 }
 0x712   :  { %2561 = vmatpush3.bf16.msra.mxu1 %v3344_v44 }
 0x713   :  { %2586 = vmatprep.subr.bf16.mxu1 %v2902_v0 }
 0x7b5   :  { %v1264_v63 = vpop.f32.mrf.mxu1 }
 0x7b6   :  { %v1270_v2 = vadd.f32 %v1264_v63, %v674_v61  ;;  %v2735_v61 = vld [vmem:[#allocation11 + $0x8] sm:$0xff]   ;;  %v2736_v63 = vld [vmem:[#allocation10 + $0x10] sm:$0xff]  }
 0x7b7   :  { %v2524_v3 = vpop.f32.mrf.mxu1 }
 0x7b8   :  { %2756 = vtanh.f32 %v1270_v2  ;;  %v2737_v2 = vld [vmem:[#allocation11] sm:$0xff]   ;;  %v2738_v3 = vld [vmem:[#allocation10 + $0x8] sm:$0xff]  }
 0x7b9   :  { %v1267_v4 = vpop.f32.mrf.mxu1 }
 0x7ba   :  { %v2739_v4 = vld [vmem:[#allocation10] sm:$0xff]  }
 0x7bb   :  { %v2525_v13 = vpop.f32.mrf.mxu1 }
 0x7bc   :  { %v1985_v13 = vld [vmem:[%s3616_s11] ss:$0 sm:$0xff] }
 0x7c5   :  { %v2757_v15 = vpop.eup %2756 }
 0x7c6   :  { %v1278_v16 = vsel %vm1277_vm12, %v2757_v15, %v1227_v58  ;;  %v1279_v18 = vpack.c.bf16 %v2757_v15, %v2757_v15  ;;  %v2732_v58 = vld [vmem:[#allocation10 + $0x20] sm:$0xff]  }
 0x7c8   :  { %2543 = vmatmul.mubr.bf16.vlgmr.msra.gmra.mxu0 %v1279_v18  ;;  %v953_v18 = vadd.f32 %v3396_v62, %v3418_v36  ;;  %v2742_v36 = vld [vmem:[%s3620_s15 + $0x28] sm:$0xff]  }
 0x7c9   :  { %2567 = vmatpush3.bf16.msra.mxu0 %v3315_v37  ;;  %2582 = vmatprep.mubr.msk.bf16.mxu0 %vm2903_vm0, %v2902_v0  ;;  %v767_v37 = vadd.f32 %v3396_v62, %v3368_v45  ;;  %v1432_v45 = vld [vmem:[#allocation3] sm:$0xf] }
 0x7ca   :  { %2568 = vmatprep.subr.bf16.mxu0 %v2902_v0 }
 0x7cd   :  { %2569 = vmatpush3.bf16.msra.mxu0 %v3318_v12 }
 0x7ce   :  { %2570 = vmatprep.subr.bf16.mxu0 %v2902_v0 }
 0x7d1   :  { %2571 = vmatpush3.bf16.msra.mxu0 %v3324_v39 }
 0x7d2   :  { %2572 = vmatprep.subr.bf16.mxu0 %v2902_v0 }
 0x7d5   :  { %2573 = vmatpush3.bf16.msra.mxu0 %v3328_v40 }
 0x7d6   :  { %2574 = vmatprep.subr.bf16.mxu0 %v2902_v0 }
 0x7d9   :  { %2575 = vmatpush3.bf16.msra.mxu0 %v3332_v41 }
 0x7da   :  { %2576 = vmatprep.subr.bf16.mxu0 %v2902_v0 }
 0x7dd   :  { %2577 = vmatpush3.bf16.msra.mxu0 %v3336_v42 }
 0x7de   :  { %2578 = vmatprep.subr.bf16.mxu0 %v2902_v0 }
 0x7e1   :  { %2579 = vmatpush3.bf16.msra.mxu0 %v3340_v43  ;;  %v1327_v43 = vpop.permute.xlu1 %1326 }
 0x7e2   :  { %2580 = vmatprep.subr.bf16.mxu0 %v2902_v0  ;;  %vm1328_vm14 = vcmp.eq.s32.totalorder %v1327_v43, 1 }
 0x7e5   :  { %2581 = vmatpush3.bf16.msra.mxu0 %v3344_v44  ;;  %v2715_v44 = vld [vmem:[%s3613_s8] sm:$0xff]  }
 0x7e6   :  { %2612 = vmatprep.subr.bf16.mxu0 %v2902_v0 }
 0x888   :  { %v1315_v12 = vpop.f32.mrf.mxu0 }
 0x889   :  { %v1321_v39 = vadd.f32 %v1315_v12, %v767_v37 }
 0x88a   :  { %v2544_v40 = vpop.f32.mrf.mxu0 }
 0x88b   :  { %2758 = vtanh.f32 %v1321_v39  ;;  %v2740_v39 = vld [vmem:[%s3620_s15 + $0x38] sm:$0xff]  }
 0x88c   :  { %v1318_v41 = vpop.f32.mrf.mxu0 }
 0x88e   :  { %v2545_v42 = vpop.f32.mrf.mxu0 }
 0x898   :  { %v2759_v20 = vpop.eup %2758 }
 0x899   :  { %v1329_v21 = vsel %vm1328_vm14, %v2759_v20, %v1278_v16  ;;  %v1330_v22 = vpack.c.bf16 %v2759_v20, %v2759_v20 }
 0x89b   :  { %2563 = vmatmul.mubr.bf16.vlgmr.msra.gmra.mxu1 %v1330_v22  ;;  %v1429_v22 = vpop.permute.xlu1 %1428 }
 0x89c   :  { %2587 = vmatpush3.bf16.msra.mxu1 %v2715_v44  ;;  %2588 = vmatprep.mubr.msk.bf16.mxu1 %vm2903_vm0, %v2902_v0  ;;  %v2741_v44 = vld [vmem:[%s3620_s15 + $0x30] sm:$0xff]  }
 0x89d   :  { %2592 = vmatprep.subr.bf16.mxu1 %v2902_v0 }
 0x8a3   :  { %2589 = vmatmul.mubr.msk.bf16.vlgmr.msra.gmra.mxu1 %vm168_vm1, %v1432_v45  ;;  %vm1379_vm1 = vcmp.eq.s32.totalorder %v1378_v35, 1 }
 0x8a4   :  { %2593 = vmatpush3.bf16.msra.mxu1 %v2716_v24  ;;  %2608 = vmatprep.mubr.msk.bf16.mxu1 %vm2903_vm0, %v2902_v0 }
 0x8a5   :  { %2594 = vmatprep.subr.bf16.mxu1 %v2902_v0 }
 0x8a8   :  { %2595 = vmatpush3.bf16.msra.mxu1 %v2717_v25 }
 0x8a9   :  { %2596 = vmatprep.subr.bf16.mxu1 %v2902_v0 }
 0x8ac   :  { %2597 = vmatpush3.bf16.msra.mxu1 %v2718_v27  ;;  %v2744_v27 = vld [vmem:[%s3620_s15 + $0x18] sm:$0xff]  }
 0x8ad   :  { %2598 = vmatprep.subr.bf16.mxu1 %v2902_v0 }
 0x8b0   :  { %2599 = vmatpush3.bf16.msra.mxu1 %v2719_v28  ;;  %v2745_v28 = vld [vmem:[%s3620_s15 + $0x10] sm:$0xff]  }
 0x8b1   :  { %2600 = vmatprep.subr.bf16.mxu1 %v2902_v0 }
 0x8b4   :  { %2601 = vmatpush3.bf16.msra.mxu1 %v2720_v29  ;;  %v2746_v29 = vld [vmem:[%s3620_s15 + $0x8] sm:$0xff]  }
 0x8b5   :  { %2602 = vmatprep.subr.bf16.mxu1 %v2902_v0 }
 0x8b8   :  { %2603 = vmatpush3.bf16.msra.mxu1 %v2721_v30  ;;  %v2747_v30 = vld [vmem:[%s3620_s15] sm:$0xff]  }
 0x8b9   :  { %2604 = vmatprep.subr.bf16.mxu1 %v2902_v0 }
 0x8bc   :  { %2605 = vmatpush3.bf16.msra.mxu1 %v2722_v31 }
 0x8bd   :  { %2606 = vmatprep.subr.bf16.mxu1 %v2902_v0 }
 0x8c0   :  { %2607 = vmatpush3.bf16.msra.mxu1 %v2723_v32 }
 0x8c1   :  { %2632 = vmatprep.subr.bf16.mxu1 %v2902_v0 }
 0x95b   :  { %v1366_v6 = vpop.f32.mrf.mxu1 }
 0x95c   :  { %v1372_v7 = vadd.f32 %v1366_v6, %v860_v5 }
 0x95d   :  { %v2564_v48 = vpop.f32.mrf.mxu1 }
 0x95e   :  { %2760 = vtanh.f32 %v1372_v7  ;;  %v2010_v7 = vld [vmem:[%s3619_s14] ss:$0 sm:$0xff] }
 0x95f   :  { %v1369_v8 = vpop.f32.mrf.mxu1 }
 0x961   :  { %v2565_v9 = vpop.f32.mrf.mxu1 }
 0x963   :  { %v1485_v34 = vpop.f32.mrf.mxu1 }
 0x964   :  { %v1486_v10 = vadd.f32 %v1982_v26, %v1485_v34 }
 0x965   :  { %v2590_v23 = vpop.f32.mrf.mxu1 }
 0x966   :  { %v1491_v11 = vmax.f32 %v1486_v10, 0.0  ;;  %v2011_v23 = vld [vmem:[%s3621_s16] ss:$0 sm:$0xff] }
 0x967   :  { %v1488_v38 = vpop.f32.mrf.mxu1 }
 0x968   :  { %v1492_v47 = vpack.c.bf16 %v1491_v11, %v1491_v11 }
 0x969   :  { %v2591_v17 = vpop.f32.mrf.mxu1 }
 0x96a   :  { %2609 = vmatmul.mubr.bf16.vlgmr.msra.gmra.mxu1 %v1492_v47 }
 0x96b   :  { %v2761_v49 = vpop.eup %2760  ;;  %2633 = vmatpush3.bf16.msra.mxu1 %v2726_v46  ;;  %2648 = vmatprep.mubr.msk.bf16.mxu1 %vm2903_vm0, %v2902_v0 }
 0x96c   :  { %v3538_v51 = vsel %vm1379_vm1, %v2761_v49, %v1329_v21  ;;  %v1381_v52 = vpack.c.bf16 %v2761_v49, %v2761_v49  ;;  %2634 = vmatprep.subr.bf16.mxu1 %v2902_v0  ;;  %v2743_v21 = vld [vmem:[%s3620_s15 + $0x20] sm:$0xff]  }
 0x96e   :  { %2583 = vmatmul.mubr.bf16.vlgmr.msra.gmra.mxu0 %v1381_v52 }
 0x96f   :  { %2613 = vmatpush3.bf16.msra.mxu0 %v2724_v60  ;;  %2635 = vmatpush3.bf16.msra.mxu1 %v2728_v50 }
 0x970   :  { %2614 = vmatprep.subr.bf16.mxu0 %v2902_v0  ;;  %2636 = vmatprep.subr.bf16.mxu1 %v2902_v0 }
 0x971   :  { %2628 = vmatprep.mubr.msk.bf16.mxu0 %vm2903_vm0, %v2902_v0 }
 0x973   :  { %2615 = vmatpush3.bf16.msra.mxu0 %v2725_v53  ;;  %2637 = vmatpush3.bf16.msra.mxu1 %v2730_v54 }
 0x974   :  { %2616 = vmatprep.subr.bf16.mxu0 %v2902_v0  ;;  %2638 = vmatprep.subr.bf16.mxu1 %v2902_v0 }
 0x977   :  { %2617 = vmatpush3.bf16.msra.mxu0 %v2727_v55  ;;  %2639 = vmatpush3.bf16.msra.mxu1 %v2732_v58 }
 0x978   :  { %2618 = vmatprep.subr.bf16.mxu0 %v2902_v0  ;;  %2640 = vmatprep.subr.bf16.mxu1 %v2902_v0 }
 0x97b   :  { %2619 = vmatpush3.bf16.msra.mxu0 %v2729_v56  ;;  %2641 = vmatpush3.bf16.msra.mxu1 %v2734_v19 }
 0x97c   :  { %2620 = vmatprep.subr.bf16.mxu0 %v2902_v0  ;;  %2642 = vmatprep.subr.bf16.mxu1 %v2902_v0 }
 0x97f   :  { %2621 = vmatpush3.bf16.msra.mxu0 %v2731_v57  ;;  %2643 = vmatpush3.bf16.msra.mxu1 %v2736_v63 }
 0x980   :  { %2622 = vmatprep.subr.bf16.mxu0 %v2902_v0  ;;  %2644 = vmatprep.subr.bf16.mxu1 %v2902_v0 }
 0x983   :  { %2623 = vmatpush3.bf16.msra.mxu0 %v2733_v59  ;;  %2645 = vmatpush3.bf16.msra.mxu1 %v2738_v3 }
 0x984   :  { %2624 = vmatprep.subr.bf16.mxu0 %v2902_v0  ;;  %2646 = vmatprep.subr.bf16.mxu1 %v2902_v0 }
 0x987   :  { %2625 = vmatpush3.bf16.msra.mxu0 %v2735_v61  ;;  %2647 = vmatpush3.bf16.msra.mxu1 %v2739_v4 }
 0x988   :  { %2626 = vmatprep.subr.bf16.mxu0 %v2902_v0 }
 0x98b   :  { %2627 = vmatpush3.bf16.msra.mxu0 %v2737_v2 }
 0x98c   :  { %2652 = vmatprep.subr.bf16.mxu0 %v2902_v0 }
 0xa2a   :  { %v1598_v14 = vpop.f32.mrf.mxu1 }
 0xa2b   :  { %v1599_v15 = vadd.f32 %v1985_v13, %v1598_v14 }
 0xa2c   :  { %v2610_v16 = vpop.f32.mrf.mxu1 }
 0xa2d   :  { %v1604_v1 = vmax.f32 %v1599_v15, 0.0 }
 0xa2e   :  { %v1417_v37 = vpop.f32.mrf.mxu0  ;;  %v1601_v12 = vpop.f32.mrf.mxu1 }
 0xa2f   :  { %v1423_v40 = vadd.f32 %v1417_v37, %v953_v18  ;;  %v1622_v41 = vpack.c.bf16 %v1604_v1, %v1604_v1 }
 0xa30   :  { %v2584_v42 = vpop.f32.mrf.mxu0  ;;  %v2611_v43 = vpop.f32.mrf.mxu1 }
 0xa31   :  { %2762 = vtanh.f32 %v1423_v40  ;;  %2629 = vmatmul.mubr.bf16.vlgmr.msra.gmra.mxu0 %v1622_v41 }
 0xa32   :  { %v1420_v20 = vpop.f32.mrf.mxu0  ;;  %2653 = vmatpush3.bf16.msra.mxu0 %v2740_v39  ;;  %2668 = vmatprep.mubr.msk.bf16.mxu0 %vm2903_vm0, %v2902_v0  ;;  %vm1430_vm0 = vcmp.eq.s32.totalorder %v1429_v22, 1 }
 0xa33   :  { %2654 = vmatprep.subr.bf16.mxu0 %v2902_v0 }
 0xa34   :  { %v2585_v62 = vpop.f32.mrf.mxu0 }
 0xa36   :  { %2655 = vmatpush3.bf16.msra.mxu0 %v2741_v44 }
 0xa37   :  { %2656 = vmatprep.subr.bf16.mxu0 %v2902_v0 }
 0xa3a   :  { %2657 = vmatpush3.bf16.msra.mxu0 %v2742_v36 }
 0xa3b   :  { %2658 = vmatprep.subr.bf16.mxu0 %v2902_v0 }
 0xa3e   :  { %v2763_v45 = vpop.eup %2762  ;;  %2659 = vmatpush3.bf16.msra.mxu0 %v2743_v21 }
 0xa3f   :  { %v1431_v24 = vsel %vm1430_vm0, %v2763_v45, %v3538_v51  ;;  %2660 = vmatprep.subr.bf16.mxu0 %v2902_v0 }
 0xa40   :  { %v1605_v25 = vpack.c.bf16 %v1431_v24, %v1431_v24 }
 0xa42   :  { %2649 = vmatmul.mubr.bf16.vlgmr.msra.gmra.mxu1 %v1605_v25  ;;  %2661 = vmatpush3.bf16.msra.mxu0 %v2744_v27 }
 0xa43   :  { %2662 = vmatprep.subr.bf16.mxu0 %v2902_v0 }
 0xa46   :  { %2663 = vmatpush3.bf16.msra.mxu0 %v2745_v28 }
 0xa47   :  { %2664 = vmatprep.subr.bf16.mxu0 %v2902_v0 }
 0xa4a   :  { %2665 = vmatpush3.bf16.msra.mxu0 %v2746_v29 }
 0xa4b   :  { %2666 = vmatprep.subr.bf16.mxu0 %v2902_v0 }
 0xa4e   :  { %2667 = vmatpush3.bf16.msra.mxu0 %v2747_v30 }
 0xaf1   :  { %v1721_v31 = vpop.f32.mrf.mxu0 }
 0xaf3   :  { %v2630_v32 = vpop.f32.mrf.mxu0 }
 0xaf5   :  { %v1724_v33 = vpop.f32.mrf.mxu0 }
 0xaf7   :  { %v2631_v5 = vpop.f32.mrf.mxu0 }
 0xb02   :  { %v1809_v6 = vpop.f32.mrf.mxu1 }
 0xb03   :  { %v1810_v48 = vadd.f32 %v1809_v6, %v1721_v31 }
 0xb04   :  { %v2650_v8 = vpop.f32.mrf.mxu1 }
 0xb05   :  { %v1822_v9 = vadd.f32 %v2010_v7, %v1810_v48 }
 0xb06   :  { %v1812_v26 = vpop.f32.mrf.mxu1 }
 0xb07   :  { %v1823_v34 = vmax.f32 %v1822_v9, 0.0 }
 0xb08   :  { %v2651_v0 = vpop.f32.mrf.mxu1 }
 0xb09   :  { %v1824_v10 = vpack.c.bf16 %v1823_v34, %v1823_v34 }
 0xb0b   :  { %2669 = vmatmul.mubr.bf16.vlgmr.msra.gmra.mxu0 %v1824_v10 }
 0xbcb   :  { %v1930_v35 = vpop.f32.mrf.mxu0 }
 0xbcc   :  { %v1931_v11 = vadd.f32 %v2011_v23, %v1930_v35 }
 0xbcd   :  { %v2670_v38 = vpop.f32.mrf.mxu0 }
 0xbce   :  { %2764 = vtanh.f32 %v1931_v11 }
 0xbcf   :  { %v1933_v46 = vpop.f32.mrf.mxu0 }
 0xbd1   :  { %v2671_v47 = vpop.f32.mrf.mxu0 }
 0xbdb   :  { %v2765_v17 = vpop.eup %2764 }
 0xbdc   :  { %v1937_v49 = vmul.f32 2.0, %v2765_v17 }
 0xbde   :  { %1939 = vst.msk [vmem:[%s3622_s17] sm:$0xff] %vm1938_vm2, %v1937_v49 }
 0xbdf   :  { %1944 = vsyncpa [#allocation4], 1 }
 0xbe0   :  { %1945 = vsyncpa [#allocation6], 1 }
 0xbe1   :  { %1946 = vsyncpa [#allocation9], 1 }
 0xbe2   :  { %1947 = vsyncpa [#allocation12], 1 }

</bundles_post_ra>
